<compile_context>
chip_gen: v7x
topology: tpu7x:2x2x1
jax: 0.10.0
libtpu: 0.0.40
codegen_flags: <defaults>
</compile_context>

<pallas_src>
import jax
import jax.numpy as jnp
from jax import lax
from jax.experimental import pallas as pl
from jax.experimental.pallas import tpu as pltpu


# ---------------------------------------------------------------------------
# Pallas kernel
# ---------------------------------------------------------------------------
def bilstm_kernel(x_ref, wih_ref, whh_f_ref, whh_b_ref, b_ref, out_ref, xproj_ref):
    """Fused bidirectional LSTM (hoisted input projection + fwd/bwd recurrence).

    x_ref:      (S*B, E)   time-major flattened embeddings (no duplication)
    wih_ref:    (E, 8H)    [wih_fwd | wih_bwd], per-direction gate order [i|f|o|g]
    whh_*_ref:  (H, 4H)    dense per-direction recurrent weights (no zero blocks)
    b_ref:      (1, 8H)    [b_fwd | b_bwd]   (b_ih + b_hh per direction)
    out_ref:    (B, 2H)    = concat(h_forward_last, h_backward_last)
    xproj_ref:  (S*B, 8H)  VMEM scratch: hoisted input projection, both directions
    """
    SB = x_ref.shape[0]
    B = out_ref.shape[0]
    H = whh_f_ref.shape[0]
    S = SB // B
    H3, H4 = 3 * H, 4 * H

    # Hoist weight loads out of the recurrence.
    w_f = whh_f_ref[...]
    w_b = whh_b_ref[...]

    # ---- Hoisted input projection: ONE MXU matmul for all timesteps and both
    # ---- directions on the un-duplicated x; bias added once.
    xproj_ref[...] = (
        jnp.dot(x_ref[...], wih_ref[...], preferred_element_type=jnp.float32)
        + b_ref[...]
    )
    # TODO(synk): for large S, overlap this projection with the recurrence by
    # projecting time chunks from both sequence ends toward the middle (the
    # backward direction reads xproj[S-1-t]).

    # Fused recurrence state, stacked along sublanes:
    # rows [0:B] = forward direction, rows [B:2B] = backward direction.
    h2 = jnp.zeros((2 * B, H), jnp.float32)
    c2 = jnp.zeros((2 * B, H), jnp.float32)

    # Fully unrolled (S is small & static); indices/slices are fully static.
    # TODO(synk): chunked lax.fori_loop unroll for production-scale S.
    for t in range(S):
        xf = xproj_ref[t * B:(t + 1) * B, 0:H4]           # fwd gates of x_t
        xb = xproj_ref[(S - 1 - t) * B:(S - t) * B, H4:]  # bwd gates of x_{S-1-t}
        # Two dense (B,H)x(H,4H) matmuls per step -- no zero blocks.
        gf = xf + jnp.dot(h2[:B], w_f, preferred_element_type=jnp.float32)
        gb = xb + jnp.dot(h2[B:], w_b, preferred_element_type=jnp.float32)
        g2 = jnp.concatenate([gf, gb], axis=0)            # (2B, 4H)
        # Per-direction column order [i|f|o|g]: one wide sigmoid + one tanh.
        s = jax.nn.sigmoid(g2[:, :H3])                    # [i | f | o]
        g = jnp.tanh(g2[:, H3:])                          # cell gate
        c2 = s[:, H:2 * H] * c2 + s[:, 0:H] * g
        h2 = s[:, 2 * H:H3] * jnp.tanh(c2)

    # Single store; equals torch.cat((last_hidden[0], last_hidden[1]), 1).
    out_ref[...] = jnp.concatenate([h2[:B], h2[B:]], axis=-1)


# ---------------------------------------------------------------------------
# Weight packing (direction-major, per-direction gate order [i|f|o|g])
# ---------------------------------------------------------------------------
def _reorder_ifog(w, H):
    """PyTorch gate-major columns [i|f|g|o] -> [i|f|o|g]."""
    return jnp.concatenate(
        [w[:, 0:2 * H], w[:, 3 * H:4 * H], w[:, 2 * H:3 * H]], axis=-1)


def pack_bilstm_params(params):
    H = params["whh_f"].shape[0]
    wih_packed = jnp.concatenate(
        [_reorder_ifog(params["wih_f"], H), _reorder_ifog(params["wih_b"], H)],
        axis=-1)                                               # (E, 8H)
    b_packed = jnp.concatenate(
        [_reorder_ifog(params["b_f"], H), _reorder_ifog(params["b_b"], H)],
        axis=-1)                                               # (1, 8H)
    whh_f = _reorder_ifog(params["whh_f"], H)                  # (H, 4H)
    whh_b = _reorder_ifog(params["whh_b"], H)                  # (H, 4H)
    return wih_packed, whh_f, whh_b, b_packed


# ---------------------------------------------------------------------------
# Forward wrapper
# ---------------------------------------------------------------------------
def sentence_bilstm_forward(sentence_idx, embed_table, params):
    """Full SentenceBiLSTM forward. Embedding gather stays as XLA glue; the
    whole BiLSTM (input projection + fused fwd/bwd recurrence) is one Pallas
    kernel."""
    B, S = sentence_idx.shape
    E = embed_table.shape[1]
    H = params["whh_f"].shape[0]

    # Fill the f32 sublane tile: pad batch to a multiple of 8 (padded rows are
    # independent and sliced off afterwards).
    B_pad = -(-B // 8) * 8
    idx_t = jnp.transpose(sentence_idx)                        # (S, B)
    if B_pad != B:
        idx_t = jnp.pad(idx_t, ((0, 0), (0, B_pad - B)))

    # Gather directly in time-major order -> no separate activation transpose,
    # no duplicated/reversed activation copy.
    # TODO(synk): fuse the gather into the kernel (scalar-prefetch DMA gather)
    # for large vocab / long sequences.
    x = embed_table[idx_t].astype(jnp.float32)                 # (S, B_pad, E)
    x_flat = x.reshape(S * B_pad, E)                           # (S*B_pad, E)

    wih_p, whh_f_p, whh_b_p, b_p = pack_bilstm_params(params)

    vmem = pl.BlockSpec(memory_space=pltpu.MemorySpace.VMEM)
    out = pl.pallas_call(
        bilstm_kernel,
        out_shape=jax.ShapeDtypeStruct((B_pad, 2 * H), jnp.float32),
        in_specs=[vmem] * 5,
        out_specs=vmem,
        scratch_shapes=[pltpu.VMEM((S * B_pad, 8 * H), jnp.float32)],
    )(x_flat, wih_p, whh_f_p, whh_b_p, b_p)
    return out[:B]


# ---------------------------------------------------------------------------
# Pure-JAX reference (mirrors torch.nn.LSTM(bidirectional=True) exactly)
# ---------------------------------------------------------------------------
def _lstm_step(x_t, h, c, wih, whh, b, H):
    """One PyTorch-semantics LSTM cell step. Gate order: i, f, g, o."""
    gates = (jnp.dot(x_t, wih, preferred_element_type=jnp.float32)
             + jnp.dot(h, whh, preferred_element_type=jnp.float32)
             + b)
    i = jax.nn.sigmoid(gates[:, 0:H])
    f = jax.nn.sigmoid(gates[:, H:2 * H])
    g = jnp.tanh(gates[:, 2 * H:3 * H])
    o = jax.nn.sigmoid(gates[:, 3 * H:4 * H])
    c_new = f * c + i * g
    h_new = o * jnp.tanh(c_new)
    return h_new, c_new


def reference_forward(sentence_idx, embed_table, params):
    embeds = jnp.transpose(embed_table[sentence_idx], (1, 0, 2)).astype(jnp.float32)
    S, B, _ = embeds.shape
    H = params["whh_f"].shape[0]

    def run(xs, wih, whh, b):
        def f(carry, x_t):
            h, c = carry
            h2, c2 = _lstm_step(x_t, h, c, wih, whh, b, H)
            return (h2, c2), None
        (h, _), _ = lax.scan(
            f, (jnp.zeros((B, H), jnp.float32), jnp.zeros((B, H), jnp.float32)), xs)
        return h

    h_f = run(embeds, params["wih_f"], params["whh_f"], params["b_f"])
    h_b = run(embeds[::-1], params["wih_b"], params["whh_b"], params["b_b"])
    return jnp.concatenate([h_f, h_b], axis=1)


# ---------------------------------------------------------------------------
# Init + self-test
# ---------------------------------------------------------------------------
def init_params(key, embed_dim, hidden_dim, vocab_size):
    """Deterministic parameter init (PyTorch-style uniform(-1/sqrt(H), 1/sqrt(H)))."""
    H, E = hidden_dim, embed_dim
    bound = 1.0 / jnp.sqrt(jnp.float32(H))
    keys = jax.random.split(key, 10)
    u = lambda k, shape: jax.random.uniform(k, shape, jnp.float32, -bound, bound)

    embed_table = jax.random.normal(keys[0], (vocab_size, E), jnp.float32)

    params = {
        # forward direction: weight_ih_l0^T, weight_hh_l0^T, (b_ih + b_hh)
        "wih_f": u(keys[1], (E, 4 * H)),
        "whh_f": u(keys[2], (H, 4 * H)),
        "b_f":   (u(keys[3], (1, 4 * H)) + u(keys[4], (1, 4 * H))),
        # reverse direction
        "wih_b": u(keys[5], (E, 4 * H)),
        "whh_b": u(keys[6], (H, 4 * H)),
        "b_b":   (u(keys[7], (1, 4 * H)) + u(keys[8], (1, 4 * H))),
    }
    return embed_table, params


if __name__ == "__main__":
    batch, seq_len = 2, 8
    embed_dim, hidden_dim, vocab_size = 32, 32, 50

    key = jax.random.PRNGKey(0)
    k_idx, k_par = jax.random.split(key)
    sentence_idx = jax.random.randint(k_idx, (batch, seq_len), 0, vocab_size,
                                      dtype=jnp.int32)
    embed_table, params = init_params(k_par, embed_dim, hidden_dim, vocab_size)

    out = sentence_bilstm_forward(sentence_idx, embed_table, params)
    out = jax.block_until_ready(out)

    ref = reference_forward(sentence_idx, embed_table, params)
    assert out.shape == (batch, 2 * hidden_dim)
    assert jnp.allclose(out, ref, atol=1e-5, rtol=1e-5), "mismatch vs. reference"

    print("KERNEL_OK")
</pallas_src>

<mosaic_0001>
module attributes {stable_mosaic.version = 11 : i64} {
  func.func @bilstm_kernel(%arg0: memref<64x32xf32, #tpu.memory_space<vmem>>, %arg1: memref<32x256xf32, #tpu.memory_space<vmem>>, %arg2: memref<32x128xf32, #tpu.memory_space<vmem>>, %arg3: memref<32x128xf32, #tpu.memory_space<vmem>>, %arg4: memref<1x256xf32, #tpu.memory_space<vmem>>, %arg5: memref<8x64xf32, #tpu.memory_space<vmem>>, %arg6: memref<64x256xf32, #tpu.memory_space<vmem>>) attributes {dimension_semantics = [], scalar_prefetch = 0 : i64, scratch_operands = 1 : i64, tpu.core_type = #tpu.core_type<tc>} {
    %c0 = arith.constant 0 : index
    %c0_0 = arith.constant 0 : index
    %0 = vector.load %arg2[%c0, %c0_0] : memref<32x128xf32, #tpu.memory_space<vmem>>, vector<32x128xf32>
    %c0_1 = arith.constant 0 : index
    %c0_2 = arith.constant 0 : index
    %1 = vector.load %arg3[%c0_1, %c0_2] : memref<32x128xf32, #tpu.memory_space<vmem>>, vector<32x128xf32>
    %c0_3 = arith.constant 0 : index
    %c0_4 = arith.constant 0 : index
    %2 = vector.load %arg0[%c0_3, %c0_4] : memref<64x32xf32, #tpu.memory_space<vmem>>, vector<64x32xf32>
    %c0_5 = arith.constant 0 : index
    %c0_6 = arith.constant 0 : index
    %3 = vector.load %arg1[%c0_5, %c0_6] : memref<32x256xf32, #tpu.memory_space<vmem>>, vector<32x256xf32>
    %cst = arith.constant dense<0.000000e+00> : vector<64x256xf32>
    %4 = tpu.matmul %2, %3, %cst {dimension_numbers = #tpu.dot_dimension_numbers<[1], [0], [0], [1], [0, 0, 1, 1], [], []>} : vector<64x32xf32>, vector<32x256xf32>, vector<64x256xf32> -> vector<64x256xf32>
    %c0_7 = arith.constant 0 : index
    %c0_8 = arith.constant 0 : index
    %5 = vector.load %arg4[%c0_7, %c0_8] : memref<1x256xf32, #tpu.memory_space<vmem>>, vector<1x256xf32>
    %6 = vector.broadcast %5 : vector<1x256xf32> to vector<64x256xf32>
    %7 = arith.addf %4, %6 : vector<64x256xf32>
    %c0_9 = arith.constant 0 : index
    %c0_10 = arith.constant 0 : index
    %8 = vector.load %arg6[%c0_9, %c0_10] : memref<64x256xf32, #tpu.memory_space<vmem>>, vector<64x256xf32>
    tpu.vector_store %arg6[%c0_9, %c0_10], %7 {strides = array<i32>} : memref<64x256xf32, #tpu.memory_space<vmem>>, vector<64x256xf32>,
    %cst_11 = arith.constant 0.000000e+00 : f32
    %9 = vector.broadcast %cst_11 : f32 to vector<16x32xf32>
    %cst_12 = arith.constant 0.000000e+00 : f32
    %10 = vector.broadcast %cst_12 : f32 to vector<16x32xf32>
    %c0_13 = arith.constant 0 : index
    %c0_14 = arith.constant 0 : index
    %11 = vector.load %arg6[%c0_13, %c0_14] : memref<64x256xf32, #tpu.memory_space<vmem>>, vector<8x128xf32>
    %c56 = arith.constant 56 : index
    %c128 = arith.constant 128 : index
    %12 = vector.load %arg6[%c56, %c128] : memref<64x256xf32, #tpu.memory_space<vmem>>, vector<8x128xf32>
    %13 = vector.extract_strided_slice %9 {offsets = [0, 0], sizes = [8, 32], strides = [1, 1]} : vector<16x32xf32> to vector<8x32xf32>
    %cst_15 = arith.constant dense<0.000000e+00> : vector<8x128xf32>
    %14 = tpu.matmul %13, %0, %cst_15 {dimension_numbers = #tpu.dot_dimension_numbers<[1], [0], [0], [1], [0, 0, 1, 1], [], []>} : vector<8x32xf32>, vector<32x128xf32>, vector<8x128xf32> -> vector<8x128xf32>
    %15 = arith.addf %11, %14 : vector<8x128xf32>
    %16 = vector.extract_strided_slice %9 {offsets = [8, 0], sizes = [8, 32], strides = [1, 1]} : vector<16x32xf32> to vector<8x32xf32>
    %cst_16 = arith.constant dense<0.000000e+00> : vector<8x128xf32>
    %17 = tpu.matmul %16, %1, %cst_16 {dimension_numbers = #tpu.dot_dimension_numbers<[1], [0], [0], [1], [0, 0, 1, 1], [], []>} : vector<8x32xf32>, vector<32x128xf32>, vector<8x128xf32> -> vector<8x128xf32>
    %18 = arith.addf %12, %17 : vector<8x128xf32>
    %19 = tpu.concatenate %15, %18 in 0 : vector<8x128xf32>, vector<8x128xf32> -> vector<16x128xf32>
    %20 = vector.extract_strided_slice %19 {offsets = [0, 0], sizes = [16, 96], strides = [1, 1]} : vector<16x128xf32> to vector<16x96xf32>
    %21 = arith.negf %20 : vector<16x96xf32>
    %22 = math.exp %21 : vector<16x96xf32>
    %cst_17 = arith.constant 1.000000e+00 : f32
    %23 = vector.broadcast %cst_17 : f32 to vector<16x96xf32>
    %24 = arith.addf %23, %22 : vector<16x96xf32>
    %25 = arith.divf %23, %24 : vector<16x96xf32>
    %26 = vector.extract_strided_slice %19 {offsets = [0, 96], sizes = [16, 32], strides = [1, 1]} : vector<16x128xf32> to vector<16x32xf32>
    %27 = math.tanh %26 : vector<16x32xf32>
    %28 = vector.extract_strided_slice %25 {offsets = [0, 32], sizes = [16, 32], strides = [1, 1]} : vector<16x96xf32> to vector<16x32xf32>
    %29 = arith.mulf %28, %10 : vector<16x32xf32>
    %30 = vector.extract_strided_slice %25 {offsets = [0, 0], sizes = [16, 32], strides = [1, 1]} : vector<16x96xf32> to vector<16x32xf32>
    %31 = arith.mulf %30, %27 : vector<16x32xf32>
    %32 = arith.addf %29, %31 : vector<16x32xf32>
    %33 = vector.extract_strided_slice %25 {offsets = [0, 64], sizes = [16, 32], strides = [1, 1]} : vector<16x96xf32> to vector<16x32xf32>
    %34 = math.tanh %32 : vector<16x32xf32>
    %35 = arith.mulf %33, %34 : vector<16x32xf32>
    %c8 = arith.constant 8 : index
    %c0_18 = arith.constant 0 : index
    %36 = vector.load %arg6[%c8, %c0_18] : memref<64x256xf32, #tpu.memory_space<vmem>>, vector<8x128xf32>
    %c48 = arith.constant 48 : index
    %c128_19 = arith.constant 128 : index
    %37 = vector.load %arg6[%c48, %c128_19] : memref<64x256xf32, #tpu.memory_space<vmem>>, vector<8x128xf32>
    %38 = vector.extract_strided_slice %35 {offsets = [0, 0], sizes = [8, 32], strides = [1, 1]} : vector<16x32xf32> to vector<8x32xf32>
    %cst_20 = arith.constant dense<0.000000e+00> : vector<8x128xf32>
    %39 = tpu.matmul %38, %0, %cst_20 {dimension_numbers = #tpu.dot_dimension_numbers<[1], [0], [0], [1], [0, 0, 1, 1], [], []>} : vector<8x32xf32>, vector<32x128xf32>, vector<8x128xf32> -> vector<8x128xf32>
    %40 = arith.addf %36, %39 : vector<8x128xf32>
    %41 = vector.extract_strided_slice %35 {offsets = [8, 0], sizes = [8, 32], strides = [1, 1]} : vector<16x32xf32> to vector<8x32xf32>
    %cst_21 = arith.constant dense<0.000000e+00> : vector<8x128xf32>
    %42 = tpu.matmul %41, %1, %cst_21 {dimension_numbers = #tpu.dot_dimension_numbers<[1], [0], [0], [1], [0, 0, 1, 1], [], []>} : vector<8x32xf32>, vector<32x128xf32>, vector<8x128xf32> -> vector<8x128xf32>
    %43 = arith.addf %37, %42 : vector<8x128xf32>
    %44 = tpu.concatenate %40, %43 in 0 : vector<8x128xf32>, vector<8x128xf32> -> vector<16x128xf32>
    %45 = vector.extract_strided_slice %44 {offsets = [0, 0], sizes = [16, 96], strides = [1, 1]} : vector<16x128xf32> to vector<16x96xf32>
    %46 = arith.negf %45 : vector<16x96xf32>
    %47 = math.exp %46 : vector<16x96xf32>
    %cst_22 = arith.constant 1.000000e+00 : f32
    %48 = vector.broadcast %cst_22 : f32 to vector<16x96xf32>
    %49 = arith.addf %48, %47 : vector<16x96xf32>
    %50 = arith.divf %48, %49 : vector<16x96xf32>
    %51 = vector.extract_strided_slice %44 {offsets = [0, 96], sizes = [16, 32], strides = [1, 1]} : vector<16x128xf32> to vector<16x32xf32>
    %52 = math.tanh %51 : vector<16x32xf32>
    %53 = vector.extract_strided_slice %50 {offsets = [0, 32], sizes = [16, 32], strides = [1, 1]} : vector<16x96xf32> to vector<16x32xf32>
    %54 = arith.mulf %53, %32 : vector<16x32xf32>
    %55 = vector.extract_strided_slice %50 {offsets = [0, 0], sizes = [16, 32], strides = [1, 1]} : vector<16x96xf32> to vector<16x32xf32>
    %56 = arith.mulf %55, %52 : vector<16x32xf32>
    %57 = arith.addf %54, %56 : vector<16x32xf32>
    %58 = vector.extract_strided_slice %50 {offsets = [0, 64], sizes = [16, 32], strides = [1, 1]} : vector<16x96xf32> to vector<16x32xf32>
    %59 = math.tanh %57 : vector<16x32xf32>
    %60 = arith.mulf %58, %59 : vector<16x32xf32>
    %c16 = arith.constant 16 : index
    %c0_23 = arith.constant 0 : index
    %61 = vector.load %arg6[%c16, %c0_23] : memref<64x256xf32, #tpu.memory_space<vmem>>, vector<8x128xf32>
    %c40 = arith.constant 40 : index
    %c128_24 = arith.constant 128 : index
    %62 = vector.load %arg6[%c40, %c128_24] : memref<64x256xf32, #tpu.memory_space<vmem>>, vector<8x128xf32>
    %63 = vector.extract_strided_slice %60 {offsets = [0, 0], sizes = [8, 32], strides = [1, 1]} : vector<16x32xf32> to vector<8x32xf32>
    %cst_25 = arith.constant dense<0.000000e+00> : vector<8x128xf32>
    %64 = tpu.matmul %63, %0, %cst_25 {dimension_numbers = #tpu.dot_dimension_numbers<[1], [0], [0], [1], [0, 0, 1, 1], [], []>} : vector<8x32xf32>, vector<32x128xf32>, vector<8x128xf32> -> vector<8x128xf32>
    %65 = arith.addf %61, %64 : vector<8x128xf32>
    %66 = vector.extract_strided_slice %60 {offsets = [8, 0], sizes = [8, 32], strides = [1, 1]} : vector<16x32xf32> to vector<8x32xf32>
    %cst_26 = arith.constant dense<0.000000e+00> : vector<8x128xf32>
    %67 = tpu.matmul %66, %1, %cst_26 {dimension_numbers = #tpu.dot_dimension_numbers<[1], [0], [0], [1], [0, 0, 1, 1], [], []>} : vector<8x32xf32>, vector<32x128xf32>, vector<8x128xf32> -> vector<8x128xf32>
    %68 = arith.addf %62, %67 : vector<8x128xf32>
    %69 = tpu.concatenate %65, %68 in 0 : vector<8x128xf32>, vector<8x128xf32> -> vector<16x128xf32>
    %70 = vector.extract_strided_slice %69 {offsets = [0, 0], sizes = [16, 96], strides = [1, 1]} : vector<16x128xf32> to vector<16x96xf32>
    %71 = arith.negf %70 : vector<16x96xf32>
    %72 = math.exp %71 : vector<16x96xf32>
    %cst_27 = arith.constant 1.000000e+00 : f32
    %73 = vector.broadcast %cst_27 : f32 to vector<16x96xf32>
    %74 = arith.addf %73, %72 : vector<16x96xf32>
    %75 = arith.divf %73, %74 : vector<16x96xf32>
    %76 = vector.extract_strided_slice %69 {offsets = [0, 96], sizes = [16, 32], strides = [1, 1]} : vector<16x128xf32> to vector<16x32xf32>
    %77 = math.tanh %76 : vector<16x32xf32>
    %78 = vector.extract_strided_slice %75 {offsets = [0, 32], sizes = [16, 32], strides = [1, 1]} : vector<16x96xf32> to vector<16x32xf32>
    %79 = arith.mulf %78, %57 : vector<16x32xf32>
    %80 = vector.extract_strided_slice %75 {offsets = [0, 0], sizes = [16, 32], strides = [1, 1]} : vector<16x96xf32> to vector<16x32xf32>
    %81 = arith.mulf %80, %77 : vector<16x32xf32>
    %82 = arith.addf %79, %81 : vector<16x32xf32>
    %83 = vector.extract_strided_slice %75 {offsets = [0, 64], sizes = [16, 32], strides = [1, 1]} : vector<16x96xf32> to vector<16x32xf32>
    %84 = math.tanh %82 : vector<16x32xf32>
    %85 = arith.mulf %83, %84 : vector<16x32xf32>
    %c24 = arith.constant 24 : index
    %c0_28 = arith.constant 0 : index
    %86 = vector.load %arg6[%c24, %c0_28] : memref<64x256xf32, #tpu.memory_space<vmem>>, vector<8x128xf32>
    %c32 = arith.constant 32 : index
    %c128_29 = arith.constant 128 : index
    %87 = vector.load %arg6[%c32, %c128_29] : memref<64x256xf32, #tpu.memory_space<vmem>>, vector<8x128xf32>
    %88 = vector.extract_strided_slice %85 {offsets = [0, 0], sizes = [8, 32], strides = [1, 1]} : vector<16x32xf32> to vector<8x32xf32>
    %cst_30 = arith.constant dense<0.000000e+00> : vector<8x128xf32>
    %89 = tpu.matmul %88, %0, %cst_30 {dimension_numbers = #tpu.dot_dimension_numbers<[1], [0], [0], [1], [0, 0, 1, 1], [], []>} : vector<8x32xf32>, vector<32x128xf32>, vector<8x128xf32> -> vector<8x128xf32>
    %90 = arith.addf %86, %89 : vector<8x128xf32>
    %91 = vector.extract_strided_slice %85 {offsets = [8, 0], sizes = [8, 32], strides = [1, 1]} : vector<16x32xf32> to vector<8x32xf32>
    %cst_31 = arith.constant dense<0.000000e+00> : vector<8x128xf32>
    %92 = tpu.matmul %91, %1, %cst_31 {dimension_numbers = #tpu.dot_dimension_numbers<[1], [0], [0], [1], [0, 0, 1, 1], [], []>} : vector<8x32xf32>, vector<32x128xf32>, vector<8x128xf32> -> vector<8x128xf32>
    %93 = arith.addf %87, %92 : vector<8x128xf32>
    %94 = tpu.concatenate %90, %93 in 0 : vector<8x128xf32>, vector<8x128xf32> -> vector<16x128xf32>
    %95 = vector.extract_strided_slice %94 {offsets = [0, 0], sizes = [16, 96], strides = [1, 1]} : vector<16x128xf32> to vector<16x96xf32>
    %96 = arith.negf %95 : vector<16x96xf32>
    %97 = math.exp %96 : vector<16x96xf32>
    %cst_32 = arith.constant 1.000000e+00 : f32
    %98 = vector.broadcast %cst_32 : f32 to vector<16x96xf32>
    %99 = arith.addf %98, %97 : vector<16x96xf32>
    %100 = arith.divf %98, %99 : vector<16x96xf32>
    %101 = vector.extract_strided_slice %94 {offsets = [0, 96], sizes = [16, 32], strides = [1, 1]} : vector<16x128xf32> to vector<16x32xf32>
    %102 = math.tanh %101 : vector<16x32xf32>
    %103 = vector.extract_strided_slice %100 {offsets = [0, 32], sizes = [16, 32], strides = [1, 1]} : vector<16x96xf32> to vector<16x32xf32>
    %104 = arith.mulf %103, %82 : vector<16x32xf32>
    %105 = vector.extract_strided_slice %100 {offsets = [0, 0], sizes = [16, 32], strides = [1, 1]} : vector<16x96xf32> to vector<16x32xf32>
    %106 = arith.mulf %105, %102 : vector<16x32xf32>
    %107 = arith.addf %104, %106 : vector<16x32xf32>
    %108 = vector.extract_strided_slice %100 {offsets = [0, 64], sizes = [16, 32], strides = [1, 1]} : vector<16x96xf32> to vector<16x32xf32>
    %109 = math.tanh %107 : vector<16x32xf32>
    %110 = arith.mulf %108, %109 : vector<16x32xf32>
    %c32_33 = arith.constant 32 : index
    %c0_34 = arith.constant 0 : index
    %111 = vector.load %arg6[%c32_33, %c0_34] : memref<64x256xf32, #tpu.memory_space<vmem>>, vector<8x128xf32>
    %c24_35 = arith.constant 24 : index
    %c128_36 = arith.constant 128 : index
    %112 = vector.load %arg6[%c24_35, %c128_36] : memref<64x256xf32, #tpu.memory_space<vmem>>, vector<8x128xf32>
    %113 = vector.extract_strided_slice %110 {offsets = [0, 0], sizes = [8, 32], strides = [1, 1]} : vector<16x32xf32> to vector<8x32xf32>
    %cst_37 = arith.constant dense<0.000000e+00> : vector<8x128xf32>
    %114 = tpu.matmul %113, %0, %cst_37 {dimension_numbers = #tpu.dot_dimension_numbers<[1], [0], [0], [1], [0, 0, 1, 1], [], []>} : vector<8x32xf32>, vector<32x128xf32>, vector<8x128xf32> -> vector<8x128xf32>
    %115 = arith.addf %111, %114 : vector<8x128xf32>
    %116 = vector.extract_strided_slice %110 {offsets = [8, 0], sizes = [8, 32], strides = [1, 1]} : vector<16x32xf32> to vector<8x32xf32>
    %cst_38 = arith.constant dense<0.000000e+00> : vector<8x128xf32>
    %117 = tpu.matmul %116, %1, %cst_38 {dimension_numbers = #tpu.dot_dimension_numbers<[1], [0], [0], [1], [0, 0, 1, 1], [], []>} : vector<8x32xf32>, vector<32x128xf32>, vector<8x128xf32> -> vector<8x128xf32>
    %118 = arith.addf %112, %117 : vector<8x128xf32>
    %119 = tpu.concatenate %115, %118 in 0 : vector<8x128xf32>, vector<8x128xf32> -> vector<16x128xf32>
    %120 = vector.extract_strided_slice %119 {offsets = [0, 0], sizes = [16, 96], strides = [1, 1]} : vector<16x128xf32> to vector<16x96xf32>
    %121 = arith.negf %120 : vector<16x96xf32>
    %122 = math.exp %121 : vector<16x96xf32>
    %cst_39 = arith.constant 1.000000e+00 : f32
    %123 = vector.broadcast %cst_39 : f32 to vector<16x96xf32>
    %124 = arith.addf %123, %122 : vector<16x96xf32>
    %125 = arith.divf %123, %124 : vector<16x96xf32>
    %126 = vector.extract_strided_slice %119 {offsets = [0, 96], sizes = [16, 32], strides = [1, 1]} : vector<16x128xf32> to vector<16x32xf32>
    %127 = math.tanh %126 : vector<16x32xf32>
    %128 = vector.extract_strided_slice %125 {offsets = [0, 32], sizes = [16, 32], strides = [1, 1]} : vector<16x96xf32> to vector<16x32xf32>
    %129 = arith.mulf %128, %107 : vector<16x32xf32>
    %130 = vector.extract_strided_slice %125 {offsets = [0, 0], sizes = [16, 32], strides = [1, 1]} : vector<16x96xf32> to vector<16x32xf32>
    %131 = arith.mulf %130, %127 : vector<16x32xf32>
    %132 = arith.addf %129, %131 : vector<16x32xf32>
    %133 = vector.extract_strided_slice %125 {offsets = [0, 64], sizes = [16, 32], strides = [1, 1]} : vector<16x96xf32> to vector<16x32xf32>
    %134 = math.tanh %132 : vector<16x32xf32>
    %135 = arith.mulf %133, %134 : vector<16x32xf32>
    %c40_40 = arith.constant 40 : index
    %c0_41 = arith.constant 0 : index
    %136 = vector.load %arg6[%c40_40, %c0_41] : memref<64x256xf32, #tpu.memory_space<vmem>>, vector<8x128xf32>
    %c16_42 = arith.constant 16 : index
    %c128_43 = arith.constant 128 : index
    %137 = vector.load %arg6[%c16_42, %c128_43] : memref<64x256xf32, #tpu.memory_space<vmem>>, vector<8x128xf32>
    %138 = vector.extract_strided_slice %135 {offsets = [0, 0], sizes = [8, 32], strides = [1, 1]} : vector<16x32xf32> to vector<8x32xf32>
    %cst_44 = arith.constant dense<0.000000e+00> : vector<8x128xf32>
    %139 = tpu.matmul %138, %0, %cst_44 {dimension_numbers = #tpu.dot_dimension_numbers<[1], [0], [0], [1], [0, 0, 1, 1], [], []>} : vector<8x32xf32>, vector<32x128xf32>, vector<8x128xf32> -> vector<8x128xf32>
    %140 = arith.addf %136, %139 : vector<8x128xf32>
    %141 = vector.extract_strided_slice %135 {offsets = [8, 0], sizes = [8, 32], strides = [1, 1]} : vector<16x32xf32> to vector<8x32xf32>
    %cst_45 = arith.constant dense<0.000000e+00> : vector<8x128xf32>
    %142 = tpu.matmul %141, %1, %cst_45 {dimension_numbers = #tpu.dot_dimension_numbers<[1], [0], [0], [1], [0, 0, 1, 1], [], []>} : vector<8x32xf32>, vector<32x128xf32>, vector<8x128xf32> -> vector<8x128xf32>
    %143 = arith.addf %137, %142 : vector<8x128xf32>
    %144 = tpu.concatenate %140, %143 in 0 : vector<8x128xf32>, vector<8x128xf32> -> vector<16x128xf32>
    %145 = vector.extract_strided_slice %144 {offsets = [0, 0], sizes = [16, 96], strides = [1, 1]} : vector<16x128xf32> to vector<16x96xf32>
    %146 = arith.negf %145 : vector<16x96xf32>
    %147 = math.exp %146 : vector<16x96xf32>
    %cst_46 = arith.constant 1.000000e+00 : f32
    %148 = vector.broadcast %cst_46 : f32 to vector<16x96xf32>
    %149 = arith.addf %148, %147 : vector<16x96xf32>
    %150 = arith.divf %148, %149 : vector<16x96xf32>
    %151 = vector.extract_strided_slice %144 {offsets = [0, 96], sizes = [16, 32], strides = [1, 1]} : vector<16x128xf32> to vector<16x32xf32>
    %152 = math.tanh %151 : vector<16x32xf32>
    %153 = vector.extract_strided_slice %150 {offsets = [0, 32], sizes = [16, 32], strides = [1, 1]} : vector<16x96xf32> to vector<16x32xf32>
    %154 = arith.mulf %153, %132 : vector<16x32xf32>
    %155 = vector.extract_strided_slice %150 {offsets = [0, 0], sizes = [16, 32], strides = [1, 1]} : vector<16x96xf32> to vector<16x32xf32>
    %156 = arith.mulf %155, %152 : vector<16x32xf32>
    %157 = arith.addf %154, %156 : vector<16x32xf32>
    %158 = vector.extract_strided_slice %150 {offsets = [0, 64], sizes = [16, 32], strides = [1, 1]} : vector<16x96xf32> to vector<16x32xf32>
    %159 = math.tanh %157 : vector<16x32xf32>
    %160 = arith.mulf %158, %159 : vector<16x32xf32>
    %c48_47 = arith.constant 48 : index
    %c0_48 = arith.constant 0 : index
    %161 = vector.load %arg6[%c48_47, %c0_48] : memref<64x256xf32, #tpu.memory_space<vmem>>, vector<8x128xf32>
    %c8_49 = arith.constant 8 : index
    %c128_50 = arith.constant 128 : index
    %162 = vector.load %arg6[%c8_49, %c128_50] : memref<64x256xf32, #tpu.memory_space<vmem>>, vector<8x128xf32>
    %163 = vector.extract_strided_slice %160 {offsets = [0, 0], sizes = [8, 32], strides = [1, 1]} : vector<16x32xf32> to vector<8x32xf32>
    %cst_51 = arith.constant dense<0.000000e+00> : vector<8x128xf32>
    %164 = tpu.matmul %163, %0, %cst_51 {dimension_numbers = #tpu.dot_dimension_numbers<[1], [0], [0], [1], [0, 0, 1, 1], [], []>} : vector<8x32xf32>, vector<32x128xf32>, vector<8x128xf32> -> vector<8x128xf32>
    %165 = arith.addf %161, %164 : vector<8x128xf32>
    %166 = vector.extract_strided_slice %160 {offsets = [8, 0], sizes = [8, 32], strides = [1, 1]} : vector<16x32xf32> to vector<8x32xf32>
    %cst_52 = arith.constant dense<0.000000e+00> : vector<8x128xf32>
    %167 = tpu.matmul %166, %1, %cst_52 {dimension_numbers = #tpu.dot_dimension_numbers<[1], [0], [0], [1], [0, 0, 1, 1], [], []>} : vector<8x32xf32>, vector<32x128xf32>, vector<8x128xf32> -> vector<8x128xf32>
    %168 = arith.addf %162, %167 : vector<8x128xf32>
    %169 = tpu.concatenate %165, %168 in 0 : vector<8x128xf32>, vector<8x128xf32> -> vector<16x128xf32>
    %170 = vector.extract_strided_slice %169 {offsets = [0, 0], sizes = [16, 96], strides = [1, 1]} : vector<16x128xf32> to vector<16x96xf32>
    %171 = arith.negf %170 : vector<16x96xf32>
    %172 = math.exp %171 : vector<16x96xf32>
    %cst_53 = arith.constant 1.000000e+00 : f32
    %173 = vector.broadcast %cst_53 : f32 to vector<16x96xf32>
    %174 = arith.addf %173, %172 : vector<16x96xf32>
    %175 = arith.divf %173, %174 : vector<16x96xf32>
    %176 = vector.extract_strided_slice %169 {offsets = [0, 96], sizes = [16, 32], strides = [1, 1]} : vector<16x128xf32> to vector<16x32xf32>
    %177 = math.tanh %176 : vector<16x32xf32>
    %178 = vector.extract_strided_slice %175 {offsets = [0, 32], sizes = [16, 32], strides = [1, 1]} : vector<16x96xf32> to vector<16x32xf32>
    %179 = arith.mulf %178, %157 : vector<16x32xf32>
    %180 = vector.extract_strided_slice %175 {offsets = [0, 0], sizes = [16, 32], strides = [1, 1]} : vector<16x96xf32> to vector<16x32xf32>
    %181 = arith.mulf %180, %177 : vector<16x32xf32>
    %182 = arith.addf %179, %181 : vector<16x32xf32>
    %183 = vector.extract_strided_slice %175 {offsets = [0, 64], sizes = [16, 32], strides = [1, 1]} : vector<16x96xf32> to vector<16x32xf32>
    %184 = math.tanh %182 : vector<16x32xf32>
    %185 = arith.mulf %183, %184 : vector<16x32xf32>
    %c56_54 = arith.constant 56 : index
    %c0_55 = arith.constant 0 : index
    %186 = vector.load %arg6[%c56_54, %c0_55] : memref<64x256xf32, #tpu.memory_space<vmem>>, vector<8x128xf32>
    %c0_56 = arith.constant 0 : index
    %c128_57 = arith.constant 128 : index
    %187 = vector.load %arg6[%c0_56, %c128_57] : memref<64x256xf32, #tpu.memory_space<vmem>>, vector<8x128xf32>
    %188 = vector.extract_strided_slice %185 {offsets = [0, 0], sizes = [8, 32], strides = [1, 1]} : vector<16x32xf32> to vector<8x32xf32>
    %cst_58 = arith.constant dense<0.000000e+00> : vector<8x128xf32>
    %189 = tpu.matmul %188, %0, %cst_58 {dimension_numbers = #tpu.dot_dimension_numbers<[1], [0], [0], [1], [0, 0, 1, 1], [], []>} : vector<8x32xf32>, vector<32x128xf32>, vector<8x128xf32> -> vector<8x128xf32>
    %190 = arith.addf %186, %189 : vector<8x128xf32>
    %191 = vector.extract_strided_slice %185 {offsets = [8, 0], sizes = [8, 32], strides = [1, 1]} : vector<16x32xf32> to vector<8x32xf32>
    %cst_59 = arith.constant dense<0.000000e+00> : vector<8x128xf32>
    %192 = tpu.matmul %191, %1, %cst_59 {dimension_numbers = #tpu.dot_dimension_numbers<[1], [0], [0], [1], [0, 0, 1, 1], [], []>} : vector<8x32xf32>, vector<32x128xf32>, vector<8x128xf32> -> vector<8x128xf32>
    %193 = arith.addf %187, %192 : vector<8x128xf32>
    %194 = tpu.concatenate %190, %193 in 0 : vector<8x128xf32>, vector<8x128xf32> -> vector<16x128xf32>
    %195 = vector.extract_strided_slice %194 {offsets = [0, 0], sizes = [16, 96], strides = [1, 1]} : vector<16x128xf32> to vector<16x96xf32>
    %196 = arith.negf %195 : vector<16x96xf32>
    %197 = math.exp %196 : vector<16x96xf32>
    %cst_60 = arith.constant 1.000000e+00 : f32
    %198 = vector.broadcast %cst_60 : f32 to vector<16x96xf32>
    %199 = arith.addf %198, %197 : vector<16x96xf32>
    %200 = arith.divf %198, %199 : vector<16x96xf32>
    %201 = vector.extract_strided_slice %194 {offsets = [0, 96], sizes = [16, 32], strides = [1, 1]} : vector<16x128xf32> to vector<16x32xf32>
    %202 = math.tanh %201 : vector<16x32xf32>
    %203 = vector.extract_strided_slice %200 {offsets = [0, 32], sizes = [16, 32], strides = [1, 1]} : vector<16x96xf32> to vector<16x32xf32>
    %204 = arith.mulf %203, %182 : vector<16x32xf32>
    %205 = vector.extract_strided_slice %200 {offsets = [0, 0], sizes = [16, 32], strides = [1, 1]} : vector<16x96xf32> to vector<16x32xf32>
    %206 = arith.mulf %205, %202 : vector<16x32xf32>
    %207 = arith.addf %204, %206 : vector<16x32xf32>
    %208 = vector.extract_strided_slice %200 {offsets = [0, 64], sizes = [16, 32], strides = [1, 1]} : vector<16x96xf32> to vector<16x32xf32>
    %209 = math.tanh %207 : vector<16x32xf32>
    %210 = arith.mulf %208, %209 : vector<16x32xf32>
    %211 = vector.extract_strided_slice %210 {offsets = [0, 0], sizes = [8, 32], strides = [1, 1]} : vector<16x32xf32> to vector<8x32xf32>
    %212 = vector.extract_strided_slice %210 {offsets = [8, 0], sizes = [8, 32], strides = [1, 1]} : vector<16x32xf32> to vector<8x32xf32>
    %213 = tpu.concatenate %211, %212 in 1 : vector<8x32xf32>, vector<8x32xf32> -> vector<8x64xf32>
    %c0_61 = arith.constant 0 : index
    %c0_62 = arith.constant 0 : index
    %214 = vector.load %arg5[%c0_61, %c0_62] : memref<8x64xf32, #tpu.memory_space<vmem>>, vector<8x64xf32>
    tpu.vector_store %arg5[%c0_61, %c0_62], %213 {strides = array<i32>} : memref<8x64xf32, #tpu.memory_space<vmem>>, vector<8x64xf32>,
    return
  }
}

</mosaic_0001>

<bundles_post_ra>
// kernel: tpu_custom_call.1
= control target key start
LH: loop header
LB: loop body
LE: loop exit
PB: predicated region body
PF: predicated region fallthrough
CT: control target
= control target key end

     0   :  { %10 = vsyncpa [#allocation4], 0  ;;  %s2813_s0 = inlined_call_operand.vmem [shape: f32[64,32], index: 0, kind: input, shape index: {}]   ;;  %s2814_s1 = inlined_call_operand.vmem [shape: f32[32,256], index: 1, kind: input, shape index: {}]   ;;  %s2815_s2 = inlined_call_operand.vmem [shape: f32[32,128], index: 2, kind: input, shape index: {}]   ;;  %s2816_s3 = inlined_call_operand.hbm [shape: f32[32,128], index: 3, kind: input, shape index: {}]   ;;  %s2817_s4 = inlined_call_operand.vmem [shape: f32[1,256], index: 4, kind: input, shape index: {}]   ;;  %s2818_s5 = inlined_call_operand.hbm [shape: f32[8,64], index: 5, kind: output, shape index: {}]  }
   0x1   :  { %11 = vsyncpa [#allocation5], 0  ;;  %s2444_s18 = smov [#allocation3]   ;;  %s2396_s22 = scalar_lea.hbm %s2816_s3, 512 }
   0x2   :  { %s23_s19 = sshll.u32 %s2444_s18, 4  ;;  %p2397_p0 = scmp.ne.s32.totalorder %s2816_s3, %s2396_s22  ;;  %s24_s19 = int_to_ptr.vmem [resolvable:$true] %s23_s19 }
   0x3   :  { %p2400_p1 = scmp.lt.u32.totalorder %s2396_s22, %s2816_s3 }
   0x5   :  { %p2402_p2 = pnand %p2400_p1, %p2397_p0 }
   0x7   :  { %2405 = shalt.err (!%p2402_p2)
}
   0x8   :  { %s2406_s27 = scalar_lea.vmem %s24_s19, 512  ;;  %p2411_p4 = scmp.lt.s32.totalorder %s24_s19, %s24_s19 }
   0x9   :  { %p2407_p3 = scmp.ne.s32.totalorder %s24_s19, %s2406_s27  ;;  %p2412_p5 = scmp.lt.s32.totalorder %s2406_s27, %s2406_s27 }
   0xb   :  { %p2413_p6 = por %p2412_p5, %p2411_p4 }
   0xd   :  { %p2414_p7 = pnand %p2413_p6, %p2407_p3 }
   0xf   :  { %2417 = shalt.err (!%p2414_p7)
}
  0x10   :  { %s2445_s28 = smov 128   ;;  %s2446_s29 = smov 8  }
  0x11   :  { %29 = dma.hbm_to_vmem [thread:$0]  %s2816_s3, 512, %s24_s19, [#allocation4], %s2445_s28, %s2445_s28, %s2446_s29  }
  0x12   :  { %2440 = dma.done.wait [#allocation4], 512  }
  0x13   :  { %2441 = vsyncadd [#allocation4], 4294966784  ;;  %v2447_v0 = vmov 0.0|0.0   ;;  %v2448_v1 = vmov 0.0   ;;  %vm2449_vm0 = vmmov 0   ;;  %v52_v2 = vld [vmem:[%s2814_s1 + $0x8] sm:$0xff]  ;;  %v61_v34 = vlaneseq }
  0x14   :  { %2162 = vmatprep.subr.bf16.mxu1 %v2447_v0  ;;  %160 = vmatprep.mubr.f32.mxu0 %v2448_v1  ;;  %v54_v3 = vld [vmem:[%s2814_s1 + $0x18] sm:$0xff]  ;;  %v51_v4 = vld [vmem:[%s2814_s1] sm:$0xff]  ;;  %v53_v6 = vld [vmem:[%s2814_s1 + $0x10] sm:$0xff]  ;;  %vm71_vm1 = vcmask 261120   ;;  %s2452_s20 = smov 96   ;;  %s2453_s21 = smov [#allocation6]  }
  0x15   :  { %1986 = vmatprep.mubr.msk.f32.mxu1 %vm2449_vm0, %v2448_v1  ;;  %v2154_v5 = vpack.c.bf16 %v54_v3, %v52_v2  ;;  %v35_v7 = vld [vmem:[%s2815_s2] sm:$0xff]  ;;  %v36_v8 = vld [vmem:[%s2815_s2 + $0x8] sm:$0xff]  ;;  %v2156_v9 = vpack.c.bf16 %v53_v6, %v51_v4  ;;  %v58_v12 = vld [vmem:[%s2814_s1 + $0x38] sm:$0xff]  ;;  %v62_v35 = vshrl.u32 %v61_v34, 7  ;;  %s1851_s22 = sshll.u32 %s2453_s21, 4  ;;  %vm1843_vm2 = vcmask 523264   ;;  %s1852_s22 = int_to_ptr.vmem [resolvable:$true] %s1851_s22 }
  0x16   :  { %v2518_v10 = vpack.c.bf16 %v36_v8, %v35_v7  ;;  %v56_v11 = vld [vmem:[%s2814_s1 + $0x28] sm:$0xff]  ;;  %v55_v13 = vld [vmem:[%s2814_s1 + $0x20] sm:$0xff]  ;;  %v57_v15 = vld [vmem:[%s2814_s1 + $0x30] sm:$0xff]  ;;  %s2418_s23 = scalar_lea.vmem %s1852_s22, 128  ;;  %p2423_p9 = scmp.lt.s32.totalorder %s1852_s22, %s1852_s22 }
  0x17   :  { %2155 = vmatprep.subr.bf16.mxu0 %v2154_v5  ;;  %v2158_v14 = vpack.c.bf16 %v58_v12, %v56_v11  ;;  %v37_v16 = vld [vmem:[%s2815_s2 + $0x10] sm:$0xff]  ;;  %v38_v17 = vld [vmem:[%s2815_s2 + $0x18] sm:$0xff]  ;;  %v2160_v18 = vpack.c.bf16 %v57_v15, %v55_v13  ;;  %v39_v20 = vld [vmem:[#allocation3] sm:$0xff]  ;;  %v63_v36 = vsub.s32 0, %v62_v35  ;;  %v67_v38 = vsub.s32 1, %v62_v35  ;;  %p2419_p8 = scmp.ne.s32.totalorder %s1852_s22, %s2418_s23  ;;  %p2424_p10 = scmp.lt.s32.totalorder %s2418_s23, %s2418_s23 }
  0x18   :  { %2157 = vmatpush1.bf16.msra.mxu0 %v2156_v9  ;;  %2164 = vmatpush3.bf16.msra.mxu1 %v2518_v10  ;;  %v2539_v19 = vpack.c.bf16 %v38_v17, %v37_v16  ;;  %v40_v21 = vld [vmem:[#allocation3 + $0x8] sm:$0xff]  ;;  %v43_v22 = vld [vmem:[%s2813_s0] sm:$0xff]  ;;  %v41_v24 = vld [vmem:[#allocation3 + $0x10] sm:$0xff] }
  0x19   :  { %2159 = vmatprep.subr.bf16.mxu0 %v2158_v14  ;;  %2165 = vmatprep.subr.bf16.mxu1 %v2447_v0  ;;  %v2546_v23 = vpack.c.bf16 %v40_v21, %v39_v20  ;;  %v42_v25 = vld [vmem:[#allocation3 + $0x18] sm:$0xff]  ;;  %v44_v26 = vld [vmem:[%s2813_s0 + $0x8] sm:$0xff]  ;;  %v45_v28 = vld [vmem:[%s2813_s0 + $0x10] sm:$0xff]  ;;  %p2425_p11 = por %p2424_p10, %p2423_p9 }
  0x1a   :  { %v2557_v27 = vpack.c.bf16 %v42_v25, %v41_v24  ;;  %v46_v29 = vld [vmem:[%s2813_s0 + $0x18] sm:$0xff]  ;;  %v47_v30 = vld [vmem:[%s2813_s0 + $0x20] sm:$0xff]  ;;  %v48_v31 = vld [vmem:[%s2813_s0 + $0x28] sm:$0xff] }
  0x1b   :  { %v49_v32 = vld [vmem:[%s2813_s0 + $0x30] sm:$0xff]  ;;  %v50_v33 = vld [vmem:[%s2813_s0 + $0x38] sm:$0xff]  ;;  %v59_v37 = vld [vmem:[%s2817_s4] sm:$0x3]  ;;  %s2450_s0 = smov 32   ;;  %s2451_s4 = smov 64  }
  0x1c   :  { %2161 = vmatpush1.bf16.msra.mxu0 %v2160_v18  ;;  %2167 = vmatpush3.bf16.msra.mxu1 %v2539_v19  ;;  %v64_v39 = vrot.slane %v59_v37, %v63_v36  ;;  %v68_v40 = vrot.slane %v59_v37, %v67_v38  ;;  %p2426_p12 = pnand %p2425_p11, %p2419_p8 }
  0x1d   :  { %2168 = vmatprep.subr.bf16.mxu1 %v2447_v0  ;;  %2186 = vmatprep.subr.bf16.mxu0 %v2447_v0 }
  0x1f   :  { %1860 = vmatmul.mubr.msk.f32.vlgmr.msra.gmra.mrb[0].mxu0 %vm71_vm1, %v43_v22  ;;  %1987 = vmatmul.mubr.f32.vlgmr.msra.gmra.mrb[0].mxu1 %v2448_v1 }
  0x20   :  { %166 = vmatprep.mubr.f32.mxu0 %v2448_v1  ;;  %2170 = vmatpush3.bf16.msra.mxu1 %v2546_v23 }
  0x21   :  { %2171 = vmatprep.subr.bf16.mxu1 %v2447_v0  ;;  %1997 = vmatprep.mubr.msk.f32.mxu1 %vm2449_vm0, %v2448_v1 }
  0x22   :  { %2188 = vmatpush3.bf16.msra.mxu0 %v2518_v10 }
  0x23   :  { %1861 = vmatmul.mubr.msk.f32.gmra.mrb[2].mxu0 %vm71_vm1, %v44_v26  ;;  %2189 = vmatprep.subr.bf16.mxu0 %v2447_v0 }
  0x24   :  { %172 = vmatprep.mubr.f32.mxu0 %v2448_v1  ;;  %2173 = vmatpush3.bf16.msra.mxu1 %v2557_v27 }
  0x25   :  { %2174 = vmatprep.subr.bf16.mxu1 %v2447_v0 }
  0x26   :  { %2191 = vmatpush3.bf16.msra.mxu0 %v2539_v19 }
  0x27   :  { %1862 = vmatmul.mubr.msk.f32.gmra.mrb[4].mxu0 %vm71_vm1, %v45_v28  ;;  %1998 = vmatmul.mubr.f32.vlgmr.msra.gmra.mrb[2].mxu1 %v2448_v1 }
  0x28   :  { %178 = vmatprep.mubr.f32.mxu0 %v2448_v1  ;;  %2176 = vmatpush3.bf16.msra.mxu1 %v2518_v10 }
  0x29   :  { %2177 = vmatprep.subr.bf16.mxu1 %v2447_v0  ;;  %2008 = vmatprep.mubr.msk.f32.mxu1 %vm2449_vm0, %v2448_v1 }
  0x2a   :  { %2198 = vmatprep.subr.bf16.mxu0 %v2447_v0 }
  0x2b   :  { %1863 = vmatmul.mubr.msk.f32.gmra.mrb[6].mxu0 %vm71_vm1, %v46_v29 }
  0x2c   :  { %184 = vmatprep.mubr.f32.mxu0 %v2448_v1  ;;  %2179 = vmatpush3.bf16.msra.mxu1 %v2539_v19 }
  0x2d   :  { %2180 = vmatprep.subr.bf16.mxu1 %v2447_v0 }
  0x2f   :  { %1864 = vmatmul.mubr.msk.f32.gmra.mrb[8].mxu0 %vm71_vm1, %v47_v30 }
  0x30   :  { %190 = vmatprep.mubr.f32.mxu0 %v2448_v1 }
  0x33   :  { %1865 = vmatmul.mubr.msk.f32.gmra.mrb[10].mxu0 %vm71_vm1, %v48_v31 }
  0x34   :  { %196 = vmatprep.mubr.f32.mxu0 %v2448_v1 }
  0x37   :  { %1866 = vmatmul.mubr.msk.f32.gmra.mrb[12].mxu0 %vm71_vm1, %v49_v32 }
  0x38   :  { %202 = vmatprep.mubr.f32.mxu0 %v2448_v1 }
  0x3b   :  { %1867 = vmatmul.mubr.msk.f32.gmra.mrb[14].mxu0 %vm71_vm1, %v50_v33 }
  0x3c   :  { %2030 = vmatprep.mubr.msk.f32.mxu0 %vm2449_vm0, %v2448_v1 }
  0xf2   :  { %v162_v41 = vpop.f32.mrb[0].mxu0  ;;  %v296_v42 = vpop.f32.mrb[0].mxu1 }
  0xf3   :  { %v163_v43 = vadd.f32 %v162_v41, %v64_v39  ;;  %v164_v44 = vpop.f32.mrb[1].mxu0  ;;  %v1988_v45 = vpop.f32.mrb[1].mxu1 }
  0xf4   :  { %v2611_v46 = vadd.f32 %v164_v44, %v68_v40 }
  0xf5   :  { %v300_v47 = vadd.f32 %v296_v42, %v163_v43 }
  0xf6   :  { %v168_v48 = vpop.f32.mrb[2].mxu0 }
  0xf7   :  { %2268 = vtanh.f32 %v300_v47  ;;  %v2613_v49 = vadd.f32 %v168_v48, %v64_v39  ;;  %v170_v50 = vpop.f32.mrb[3].mxu0  ;;  %v1868_v21 = vmul.f32 -1.442695, %v300_v47 }
  0xf8   :  { %v2615_v51 = vadd.f32 %v170_v50, %v68_v40 }
  0xfa   :  { %v174_v52 = vpop.f32.mrb[4].mxu0  ;;  %v367_v53 = vpop.f32.mrb[2].mxu1 }
  0xfb   :  { %v2617_v54 = vadd.f32 %v174_v52, %v64_v39  ;;  %v176_v55 = vpop.f32.mrb[5].mxu0  ;;  %v1999_v56 = vpop.f32.mrb[3].mxu1 }
  0xfc   :  { %v2619_v57 = vadd.f32 %v176_v55, %v68_v40 }
  0xfe   :  { %v180_v58 = vpop.f32.mrb[6].mxu0 }
  0xff   :  { %v2621_v59 = vadd.f32 %v180_v58, %v64_v39  ;;  %v182_v60 = vpop.f32.mrb[7].mxu0 }
 0x100   :  { %v2623_v61 = vadd.f32 %v182_v60, %v68_v40 }
 0x101   :  { %v2269_v62 = vpop.eup %2268 }
 0x102   :  { %v186_v63 = vpop.f32.mrb[8].mxu0  ;;  %390 = vrot.lane.b32.xlu0 %v2269_v62, %s2450_s0 }
 0x103   :  { %v2626_v2 = vadd.f32 %v186_v63, %v64_v39  ;;  %v188_v3 = vpop.f32.mrb[9].mxu0 }
 0x104   :  { %v2628_v4 = vadd.f32 %v188_v3, %v68_v40 }
 0x106   :  { %v192_v5 = vpop.f32.mrb[10].mxu0 }
 0x107   :  { %v2630_v6 = vadd.f32 %v192_v5, %v64_v39  ;;  %v194_v7 = vpop.f32.mrb[11].mxu0 }
 0x108   :  { %v2632_v8 = vadd.f32 %v194_v7, %v68_v40 }
 0x10a   :  { %v198_v9 = vpop.f32.mrb[12].mxu0 }
 0x10b   :  { %v2634_v11 = vadd.f32 %v198_v9, %v64_v39  ;;  %v200_v12 = vpop.f32.mrb[13].mxu0 }
 0x10c   :  { %v2636_v13 = vadd.f32 %v200_v12, %v68_v40 }
 0x10e   :  { %v204_v14 = vpop.f32.mrb[14].mxu0 }
 0x10f   :  { %v2638_v15 = vadd.f32 %v204_v14, %v64_v39  ;;  %v206_v16 = vpop.f32.mrb[15].mxu0 }
 0x110   :  { %v207_v17 = vadd.f32 %v206_v16, %v68_v40 }
 0x112   :  { %v371_v18 = vadd.f32 %v367_v53, %v207_v17 }
 0x114   :  { %2270 = vtanh.f32 %v371_v18  ;;  %v1869_v25 = vmul.f32 -1.442695, %v371_v18 }
 0x115   :  { %2272 = vpow2.f32 %v1868_v21 }
 0x11e   :  { %v2271_v20 = vpop.eup %2270 }
 0x11f   :  { %392 = vrot.lane.b32.xlu0 %v2271_v20, %s2450_s0  ;;  %v2273_v22 = vpop.eup %2272 }
 0x120   :  { %v378_v24 = vadd.f32 1.0, %v2273_v22 }
 0x122   :  { %2274 = vrcp.f32 %v378_v24 }
 0x123   :  { %2276 = vpow2.f32 %v1869_v25 }
 0x12c   :  { %v2275_v26 = vpop.eup %2274 }
 0x12d   :  { %v2277_v30 = vpop.eup %2276  ;;  %v386_v35 = vmul.f32 0.0, %v2275_v26 }
 0x12e   :  { %v379_v31 = vadd.f32 1.0, %v2277_v30 }
 0x130   :  { %2278 = vrcp.f32 %v379_v31 }
 0x13a   :  { %v2279_v32 = vpop.eup %2278 }
 0x13b   :  { %v387_v39 = vmul.f32 0.0, %v2279_v32 }
 0x174   :  { %v391_v28 = vpop.permute.xlu0 %390 }
 0x175   :  { %v396_v29 = vmul.f32 %v2275_v26, %v391_v28 }
 0x177   :  { %400 = vrot.lane.b32.xlu1 %v396_v29, %s2450_s0 }
 0x191   :  { %v393_v33 = vpop.permute.xlu0 %392 }
 0x192   :  { %v397_v34 = vmul.f32 %v2279_v32, %v393_v33 }
 0x194   :  { %402 = vrot.lane.b32.xlu1 %v397_v34, %s2450_s0 }
 0x1e9   :  { %v401_v36 = vpop.permute.xlu1 %400 }
 0x1ea   :  { %v406_v37 = vadd.f32 %v401_v36, %v386_v35 }
 0x1ec   :  { %2280 = vtanh.f32 %v406_v37 }
 0x1f6   :  { %v2281_v38 = vpop.eup %2280 }
 0x1f7   :  { %412 = vrot.lane.b32.xlu0 %v2281_v38, %s2450_s0 }
 0x206   :  { %v403_v40 = vpop.permute.xlu1 %402 }
 0x207   :  { %v407_v41 = vadd.f32 %v403_v40, %v387_v39 }
 0x209   :  { %2282 = vtanh.f32 %v407_v41 }
 0x213   :  { %v2283_v42 = vpop.eup %2282 }
 0x214   :  { %414 = vrot.lane.b32.xlu1 %v2283_v42, %s2450_s0 }
 0x269   :  { %v413_v43 = vpop.permute.xlu0 %412 }
 0x26a   :  { %v418_v44 = vmul.f32 %v2275_v26, %v413_v43 }
 0x26c   :  { %423 = vrot.lane.b32.xlu0 %v418_v44, %s2451_s4 }
 0x286   :  { %v415_v45 = vpop.permute.xlu1 %414 }
 0x287   :  { %v419_v47 = vmul.f32 %v2279_v32, %v415_v45 }
 0x289   :  { %499 = vrot.lane.b32.xlu1 %v419_v47, %s2451_s4 }
 0x2de   :  { %v424_v48 = vpop.permute.xlu0 %423 }
 0x2df   :  { %2009 = vmatmul.mubr.msk.f32.vlgmr.msra.gmra.mrb[4].mxu1 %vm71_vm1, %v424_v48 }
 0x2e0   :  { %2182 = vmatpush3.bf16.msra.mxu1 %v2546_v23  ;;  %2019 = vmatprep.mubr.msk.f32.mxu1 %vm2449_vm0, %v2448_v1 }
 0x2e1   :  { %2183 = vmatprep.subr.bf16.mxu1 %v2447_v0 }
 0x2e4   :  { %2185 = vmatpush3.bf16.msra.mxu1 %v2557_v27 }
 0x2e5   :  { %2192 = vmatprep.subr.bf16.mxu1 %v2447_v0 }
 0x2fb   :  { %v500_v50 = vpop.permute.xlu1 %499 }
 0x2fc   :  { %2020 = vmatmul.mubr.msk.f32.vlgmr.msra.gmra.mrb[6].mxu1 %vm71_vm1, %v500_v50 }
 0x2fd   :  { %2194 = vmatpush3.bf16.msra.mxu1 %v2546_v23  ;;  %2041 = vmatprep.mubr.msk.f32.mxu1 %vm2449_vm0, %v2448_v1 }
 0x2fe   :  { %2195 = vmatprep.subr.bf16.mxu1 %v2447_v0 }
 0x301   :  { %2197 = vmatpush3.bf16.msra.mxu1 %v2557_v27 }
 0x302   :  { %2204 = vmatprep.subr.bf16.mxu1 %v2447_v0 }
 0x3b2   :  { %v493_v52 = vpop.f32.mrb[4].mxu1 }
 0x3b3   :  { %v497_v53 = vadd.f32 %v493_v52, %v2613_v49  ;;  %v2010_v55 = vpop.f32.mrb[5].mxu1 }
 0x3b5   :  { %2284 = vtanh.f32 %v497_v53  ;;  %v1872_v3 = vmul.f32 -1.442695, %v497_v53 }
 0x3bf   :  { %v2285_v56 = vpop.eup %2284 }
 0x3c0   :  { %592 = vrot.lane.b32.xlu0 %v2285_v56, %s2450_s0 }
 0x3cf   :  { %v569_v58 = vpop.f32.mrb[6].mxu1 }
 0x3d0   :  { %v573_v60 = vadd.f32 %v569_v58, %v2636_v13  ;;  %v2021_v62 = vpop.f32.mrb[7].mxu1 }
 0x3d2   :  { %2286 = vtanh.f32 %v573_v60  ;;  %v1873_v9 = vmul.f32 -1.442695, %v573_v60 }
 0x3d3   :  { %2288 = vpow2.f32 %v1872_v3 }
 0x3dc   :  { %v2287_v63 = vpop.eup %2286 }
 0x3dd   :  { %594 = vrot.lane.b32.xlu1 %v2287_v63, %s2450_s0  ;;  %v2289_v5 = vpop.eup %2288 }
 0x3de   :  { %v580_v7 = vadd.f32 1.0, %v2289_v5 }
 0x3e0   :  { %2290 = vrcp.f32 %v580_v7 }
 0x3e1   :  { %2292 = vpow2.f32 %v1873_v9 }
 0x3ea   :  { %v2291_v49 = vpop.eup %2290 }
 0x3eb   :  { %v2293_v16 = vpop.eup %2292  ;;  %v588_v21 = vmul.f32 %v2291_v49, %v406_v37 }
 0x3ec   :  { %v581_v17 = vadd.f32 1.0, %v2293_v16 }
 0x3ee   :  { %2294 = vrcp.f32 %v581_v17 }
 0x3f8   :  { %v2295_v13 = vpop.eup %2294 }
 0x3f9   :  { %v589_v26 = vmul.f32 %v2295_v13, %v407_v41 }
 0x432   :  { %v593_v12 = vpop.permute.xlu0 %592 }
 0x433   :  { %v598_v14 = vmul.f32 %v2291_v49, %v593_v12 }
 0x435   :  { %602 = vrot.lane.b32.xlu0 %v598_v14, %s2450_s0 }
 0x44f   :  { %v595_v18 = vpop.permute.xlu1 %594 }
 0x450   :  { %v599_v20 = vmul.f32 %v2295_v13, %v595_v18 }
 0x452   :  { %604 = vrot.lane.b32.xlu1 %v599_v20, %s2450_s0 }
 0x4a7   :  { %v603_v22 = vpop.permute.xlu0 %602 }
 0x4a8   :  { %v608_v24 = vadd.f32 %v603_v22, %v588_v21 }
 0x4aa   :  { %2296 = vtanh.f32 %v608_v24 }
 0x4b4   :  { %v2297_v25 = vpop.eup %2296 }
 0x4b5   :  { %614 = vrot.lane.b32.xlu0 %v2297_v25, %s2450_s0 }
 0x4c4   :  { %v605_v28 = vpop.permute.xlu1 %604 }
 0x4c5   :  { %v609_v29 = vadd.f32 %v605_v28, %v589_v26 }
 0x4c7   :  { %2298 = vtanh.f32 %v609_v29 }
 0x4d1   :  { %v2299_v30 = vpop.eup %2298 }
 0x4d2   :  { %616 = vrot.lane.b32.xlu1 %v2299_v30, %s2450_s0 }
 0x527   :  { %v615_v31 = vpop.permute.xlu0 %614 }
 0x528   :  { %v620_v32 = vmul.f32 %v2291_v49, %v615_v31 }
 0x52a   :  { %625 = vrot.lane.b32.xlu0 %v620_v32, %s2451_s4 }
 0x544   :  { %v617_v33 = vpop.permute.xlu1 %616 }
 0x545   :  { %v621_v34 = vmul.f32 %v2295_v13, %v617_v33 }
 0x547   :  { %701 = vrot.lane.b32.xlu1 %v621_v34, %s2451_s4 }
 0x59c   :  { %v626_v35 = vpop.permute.xlu0 %625 }
 0x59d   :  { %2031 = vmatmul.mubr.msk.f32.vlgmr.msra.gmra.mrb[16].mxu0 %vm71_vm1, %v626_v35 }
 0x59e   :  { %2200 = vmatpush3.bf16.msra.mxu0 %v2518_v10  ;;  %2052 = vmatprep.mubr.msk.f32.mxu0 %vm2449_vm0, %v2448_v1 }
 0x59f   :  { %2201 = vmatprep.subr.bf16.mxu0 %v2447_v0 }
 0x5a2   :  { %2203 = vmatpush3.bf16.msra.mxu0 %v2539_v19 }
 0x5a3   :  { %2210 = vmatprep.subr.bf16.mxu0 %v2447_v0 }
 0x5b9   :  { %v702_v36 = vpop.permute.xlu1 %701 }
 0x5ba   :  { %2042 = vmatmul.mubr.msk.f32.vlgmr.msra.gmra.mrb[8].mxu1 %vm71_vm1, %v702_v36 }
 0x5bb   :  { %2206 = vmatpush3.bf16.msra.mxu1 %v2546_v23  ;;  %2063 = vmatprep.mubr.msk.f32.mxu1 %vm2449_vm0, %v2448_v1 }
 0x5bc   :  { %2207 = vmatprep.subr.bf16.mxu1 %v2447_v0 }
 0x5bf   :  { %2209 = vmatpush3.bf16.msra.mxu1 %v2557_v27 }
 0x5c0   :  { %2216 = vmatprep.subr.bf16.mxu1 %v2447_v0 }
 0x670   :  { %v695_v37 = vpop.f32.mrb[16].mxu0 }
 0x671   :  { %v699_v38 = vadd.f32 %v695_v37, %v2617_v54  ;;  %v2032_v39 = vpop.f32.mrb[17].mxu0 }
 0x673   :  { %2300 = vtanh.f32 %v699_v38  ;;  %v1876_v45 = vmul.f32 -1.442695, %v699_v38 }
 0x67d   :  { %v2301_v40 = vpop.eup %2300 }
 0x67e   :  { %794 = vrot.lane.b32.xlu0 %v2301_v40, %s2450_s0 }
 0x68d   :  { %v771_v41 = vpop.f32.mrb[8].mxu1 }
 0x68e   :  { %v775_v42 = vadd.f32 %v771_v41, %v2632_v8  ;;  %v2043_v43 = vpop.f32.mrb[9].mxu1 }
 0x690   :  { %2302 = vtanh.f32 %v775_v42  ;;  %v1877_v50 = vmul.f32 -1.442695, %v775_v42 }
 0x691   :  { %2304 = vpow2.f32 %v1876_v45 }
 0x69a   :  { %v2303_v44 = vpop.eup %2302 }
 0x69b   :  { %796 = vrot.lane.b32.xlu1 %v2303_v44, %s2450_s0  ;;  %v2305_v47 = vpop.eup %2304 }
 0x69c   :  { %v782_v48 = vadd.f32 1.0, %v2305_v47 }
 0x69e   :  { %2306 = vrcp.f32 %v782_v48 }
 0x69f   :  { %2308 = vpow2.f32 %v1877_v50 }
 0x6a8   :  { %v2307_v54 = vpop.eup %2306 }
 0x6a9   :  { %v2309_v55 = vpop.eup %2308  ;;  %v790_v62 = vmul.f32 %v2307_v54, %v608_v24 }
 0x6aa   :  { %v783_v56 = vadd.f32 1.0, %v2309_v55 }
 0x6ac   :  { %2310 = vrcp.f32 %v783_v56 }
 0x6b6   :  { %v2311_v8 = vpop.eup %2310 }
 0x6b7   :  { %v791_v7 = vmul.f32 %v2311_v8, %v609_v29 }
 0x6f0   :  { %v795_v52 = vpop.permute.xlu0 %794 }
 0x6f1   :  { %v800_v53 = vmul.f32 %v2307_v54, %v795_v52 }
 0x6f3   :  { %804 = vrot.lane.b32.xlu0 %v800_v53, %s2450_s0 }
 0x70d   :  { %v797_v58 = vpop.permute.xlu1 %796 }
 0x70e   :  { %v801_v60 = vmul.f32 %v2311_v8, %v797_v58 }
 0x710   :  { %806 = vrot.lane.b32.xlu1 %v801_v60, %s2450_s0 }
 0x765   :  { %v805_v63 = vpop.permute.xlu0 %804 }
 0x766   :  { %v810_v3 = vadd.f32 %v805_v63, %v790_v62 }
 0x768   :  { %2312 = vtanh.f32 %v810_v3 }
 0x772   :  { %v2313_v5 = vpop.eup %2312 }
 0x773   :  { %816 = vrot.lane.b32.xlu0 %v2313_v5, %s2450_s0 }
 0x782   :  { %v807_v9 = vpop.permute.xlu1 %806 }
 0x783   :  { %v811_v49 = vadd.f32 %v807_v9, %v791_v7 }
 0x785   :  { %2314 = vtanh.f32 %v811_v49 }
 0x78f   :  { %v2315_v12 = vpop.eup %2314 }
 0x790   :  { %818 = vrot.lane.b32.xlu1 %v2315_v12, %s2450_s0 }
 0x7e5   :  { %v817_v14 = vpop.permute.xlu0 %816 }
 0x7e6   :  { %v822_v16 = vmul.f32 %v2307_v54, %v817_v14 }
 0x7e8   :  { %827 = vrot.lane.b32.xlu0 %v822_v16, %s2451_s4 }
 0x802   :  { %v819_v17 = vpop.permute.xlu1 %818 }
 0x803   :  { %v823_v13 = vmul.f32 %v2311_v8, %v819_v17 }
 0x805   :  { %903 = vrot.lane.b32.xlu1 %v823_v13, %s2451_s4 }
 0x85a   :  { %v828_v18 = vpop.permute.xlu0 %827 }
 0x85b   :  { %2053 = vmatmul.mubr.msk.f32.vlgmr.msra.gmra.mrb[18].mxu0 %vm71_vm1, %v828_v18 }
 0x85c   :  { %2212 = vmatpush3.bf16.msra.mxu0 %v2518_v10  ;;  %2074 = vmatprep.mubr.msk.f32.mxu0 %vm2449_vm0, %v2448_v1 }
 0x85d   :  { %2213 = vmatprep.subr.bf16.mxu0 %v2447_v0 }
 0x860   :  { %2215 = vmatpush3.bf16.msra.mxu0 %v2539_v19 }
 0x861   :  { %2222 = vmatprep.subr.bf16.mxu0 %v2447_v0 }
 0x877   :  { %v904_v20 = vpop.permute.xlu1 %903 }
 0x878   :  { %2064 = vmatmul.mubr.msk.f32.vlgmr.msra.gmra.mrb[10].mxu1 %vm71_vm1, %v904_v20 }
 0x879   :  { %2218 = vmatpush3.bf16.msra.mxu1 %v2546_v23  ;;  %2085 = vmatprep.mubr.msk.f32.mxu1 %vm2449_vm0, %v2448_v1 }
 0x87a   :  { %2219 = vmatprep.subr.bf16.mxu1 %v2447_v0 }
 0x87d   :  { %2221 = vmatpush3.bf16.msra.mxu1 %v2557_v27 }
 0x87e   :  { %2228 = vmatprep.subr.bf16.mxu1 %v2447_v0 }
 0x92e   :  { %v897_v21 = vpop.f32.mrb[18].mxu0 }
 0x92f   :  { %v901_v22 = vadd.f32 %v897_v21, %v2621_v59  ;;  %v2054_v24 = vpop.f32.mrb[19].mxu0 }
 0x931   :  { %2316 = vtanh.f32 %v901_v22  ;;  %v1880_v31 = vmul.f32 -1.442695, %v901_v22 }
 0x93b   :  { %v2317_v25 = vpop.eup %2316 }
 0x93c   :  { %996 = vrot.lane.b32.xlu0 %v2317_v25, %s2450_s0 }
 0x94b   :  { %v973_v26 = vpop.f32.mrb[10].mxu1 }
 0x94c   :  { %v977_v28 = vadd.f32 %v973_v26, %v2628_v4  ;;  %v2065_v29 = vpop.f32.mrb[11].mxu1 }
 0x94e   :  { %2318 = vtanh.f32 %v977_v28  ;;  %v1881_v34 = vmul.f32 -1.442695, %v977_v28 }
 0x94f   :  { %2320 = vpow2.f32 %v1880_v31 }
 0x958   :  { %v2319_v30 = vpop.eup %2318 }
 0x959   :  { %998 = vrot.lane.b32.xlu1 %v2319_v30, %s2450_s0  ;;  %v2321_v32 = vpop.eup %2320 }
 0x95a   :  { %v984_v33 = vadd.f32 1.0, %v2321_v32 }
 0x95c   :  { %2322 = vrcp.f32 %v984_v33 }
 0x95d   :  { %2324 = vpow2.f32 %v1881_v34 }
 0x966   :  { %v2323_v59 = vpop.eup %2322 }
 0x967   :  { %v2325_v37 = vpop.eup %2324  ;;  %v992_v41 = vmul.f32 %v2323_v59, %v810_v3 }
 0x968   :  { %v985_v38 = vadd.f32 1.0, %v2325_v37 }
 0x96a   :  { %2326 = vrcp.f32 %v985_v38 }
 0x974   :  { %v2327_v4 = vpop.eup %2326 }
 0x975   :  { %v993_v45 = vmul.f32 %v2327_v4, %v811_v49 }
 0x9ae   :  { %v997_v35 = vpop.permute.xlu0 %996 }
 0x9af   :  { %v1002_v36 = vmul.f32 %v2323_v59, %v997_v35 }
 0x9b1   :  { %1006 = vrot.lane.b32.xlu0 %v1002_v36, %s2450_s0 }
 0x9cb   :  { %v999_v39 = vpop.permute.xlu1 %998 }
 0x9cc   :  { %v1003_v40 = vmul.f32 %v2327_v4, %v999_v39 }
 0x9ce   :  { %1008 = vrot.lane.b32.xlu1 %v1003_v40, %s2450_s0 }
 0xa23   :  { %v1007_v42 = vpop.permute.xlu0 %1006 }
 0xa24   :  { %v1012_v43 = vadd.f32 %v1007_v42, %v992_v41 }
 0xa26   :  { %2328 = vtanh.f32 %v1012_v43 }
 0xa30   :  { %v2329_v44 = vpop.eup %2328 }
 0xa31   :  { %1018 = vrot.lane.b32.xlu0 %v2329_v44, %s2450_s0 }
 0xa40   :  { %v1009_v47 = vpop.permute.xlu1 %1008 }
 0xa41   :  { %v1013_v48 = vadd.f32 %v1009_v47, %v993_v45 }
 0xa43   :  { %2330 = vtanh.f32 %v1013_v48 }
 0xa4d   :  { %v2331_v50 = vpop.eup %2330 }
 0xa4e   :  { %1020 = vrot.lane.b32.xlu1 %v2331_v50, %s2450_s0 }
 0xaa3   :  { %v1019_v54 = vpop.permute.xlu0 %1018 }
 0xaa4   :  { %v1024_v52 = vmul.f32 %v2323_v59, %v1019_v54 }
 0xaa6   :  { %1029 = vrot.lane.b32.xlu0 %v1024_v52, %s2451_s4 }
 0xac0   :  { %v1021_v53 = vpop.permute.xlu1 %1020 }
 0xac1   :  { %v1025_v55 = vmul.f32 %v2327_v4, %v1021_v53 }
 0xac3   :  { %1105 = vrot.lane.b32.xlu1 %v1025_v55, %s2451_s4 }
 0xb18   :  { %v1030_v56 = vpop.permute.xlu0 %1029 }
 0xb19   :  { %2075 = vmatmul.mubr.msk.f32.vlgmr.msra.gmra.mrb[20].mxu0 %vm71_vm1, %v1030_v56 }
 0xb1a   :  { %2224 = vmatpush3.bf16.msra.mxu0 %v2518_v10  ;;  %2096 = vmatprep.mubr.msk.f32.mxu0 %vm2449_vm0, %v2448_v1 }
 0xb1b   :  { %2225 = vmatprep.subr.bf16.mxu0 %v2447_v0 }
 0xb1e   :  { %2227 = vmatpush3.bf16.msra.mxu0 %v2539_v19 }
 0xb1f   :  { %2234 = vmatprep.subr.bf16.mxu0 %v2447_v0 }
 0xb35   :  { %v1106_v8 = vpop.permute.xlu1 %1105 }
 0xb36   :  { %2086 = vmatmul.mubr.msk.f32.vlgmr.msra.gmra.mrb[12].mxu1 %vm71_vm1, %v1106_v8 }
 0xb37   :  { %2230 = vmatpush3.bf16.msra.mxu1 %v2546_v23  ;;  %2107 = vmatprep.mubr.msk.f32.mxu1 %vm2449_vm0, %v2448_v1 }
 0xb38   :  { %2231 = vmatprep.subr.bf16.mxu1 %v2447_v0 }
 0xb3b   :  { %2233 = vmatpush3.bf16.msra.mxu1 %v2557_v27 }
 0xb3c   :  { %2240 = vmatprep.subr.bf16.mxu1 %v2447_v0 }
 0xbec   :  { %v1099_v58 = vpop.f32.mrb[20].mxu0 }
 0xbed   :  { %v1103_v60 = vadd.f32 %v1099_v58, %v2626_v2  ;;  %v2076_v62 = vpop.f32.mrb[21].mxu0 }
 0xbef   :  { %2332 = vtanh.f32 %v1103_v60  ;;  %v1884_v49 = vmul.f32 -1.442695, %v1103_v60 }
 0xbf9   :  { %v2333_v63 = vpop.eup %2332 }
 0xbfa   :  { %1198 = vrot.lane.b32.xlu0 %v2333_v63, %s2450_s0 }
 0xc09   :  { %v1175_v3 = vpop.f32.mrb[12].mxu1 }
 0xc0a   :  { %v1179_v5 = vadd.f32 %v1175_v3, %v2623_v61  ;;  %v2087_v7 = vpop.f32.mrb[13].mxu1 }
 0xc0c   :  { %2334 = vtanh.f32 %v1179_v5  ;;  %v1885_v16 = vmul.f32 -1.442695, %v1179_v5 }
 0xc0d   :  { %2336 = vpow2.f32 %v1884_v49 }
 0xc16   :  { %v2335_v9 = vpop.eup %2334 }
 0xc17   :  { %1200 = vrot.lane.b32.xlu1 %v2335_v9, %s2450_s0  ;;  %v2337_v12 = vpop.eup %2336 }
 0xc18   :  { %v1186_v14 = vadd.f32 1.0, %v2337_v12 }
 0xc1a   :  { %2338 = vrcp.f32 %v1186_v14 }
 0xc1b   :  { %2340 = vpow2.f32 %v1885_v16 }
 0xc24   :  { %v2339_v2 = vpop.eup %2338 }
 0xc25   :  { %v2341_v18 = vpop.eup %2340  ;;  %v1194_v24 = vmul.f32 %v2339_v2, %v1012_v43 }
 0xc26   :  { %v1187_v20 = vadd.f32 1.0, %v2341_v18 }
 0xc28   :  { %2342 = vrcp.f32 %v1187_v20 }
 0xc32   :  { %v2343_v61 = vpop.eup %2342 }
 0xc33   :  { %v1195_v29 = vmul.f32 %v2343_v61, %v1013_v48 }
 0xc6c   :  { %v1199_v17 = vpop.permute.xlu0 %1198 }
 0xc6d   :  { %v1204_v13 = vmul.f32 %v2339_v2, %v1199_v17 }
 0xc6f   :  { %1208 = vrot.lane.b32.xlu0 %v1204_v13, %s2450_s0 }
 0xc89   :  { %v1201_v21 = vpop.permute.xlu1 %1200 }
 0xc8a   :  { %v1205_v22 = vmul.f32 %v2343_v61, %v1201_v21 }
 0xc8c   :  { %1210 = vrot.lane.b32.xlu1 %v1205_v22, %s2450_s0 }
 0xce1   :  { %v1209_v25 = vpop.permute.xlu0 %1208 }
 0xce2   :  { %v1214_v26 = vadd.f32 %v1209_v25, %v1194_v24 }
 0xce4   :  { %2344 = vtanh.f32 %v1214_v26 }
 0xcee   :  { %v2345_v28 = vpop.eup %2344 }
 0xcef   :  { %1220 = vrot.lane.b32.xlu0 %v2345_v28, %s2450_s0 }
 0xcfe   :  { %v1211_v30 = vpop.permute.xlu1 %1210 }
 0xcff   :  { %v1215_v31 = vadd.f32 %v1211_v30, %v1195_v29 }
 0xd01   :  { %2346 = vtanh.f32 %v1215_v31 }
 0xd0b   :  { %v2347_v32 = vpop.eup %2346 }
 0xd0c   :  { %1222 = vrot.lane.b32.xlu1 %v2347_v32, %s2450_s0 }
 0xd61   :  { %v1221_v33 = vpop.permute.xlu0 %1220 }
 0xd62   :  { %v1226_v34 = vmul.f32 %v2339_v2, %v1221_v33 }
 0xd64   :  { %1231 = vrot.lane.b32.xlu0 %v1226_v34, %s2451_s4 }
 0xd7e   :  { %v1223_v59 = vpop.permute.xlu1 %1222 }
 0xd7f   :  { %v1227_v35 = vmul.f32 %v2343_v61, %v1223_v59 }
 0xd81   :  { %1307 = vrot.lane.b32.xlu1 %v1227_v35, %s2451_s4 }
 0xdd6   :  { %v1232_v36 = vpop.permute.xlu0 %1231 }
 0xdd7   :  { %2097 = vmatmul.mubr.msk.f32.vlgmr.msra.gmra.mrb[22].mxu0 %vm71_vm1, %v1232_v36 }
 0xdd8   :  { %2236 = vmatpush3.bf16.msra.mxu0 %v2518_v10  ;;  %2118 = vmatprep.mubr.msk.f32.mxu0 %vm2449_vm0, %v2448_v1 }
 0xdd9   :  { %2237 = vmatprep.subr.bf16.mxu0 %v2447_v0 }
 0xddc   :  { %2239 = vmatpush3.bf16.msra.mxu0 %v2539_v19 }
 0xddd   :  { %2246 = vmatprep.subr.bf16.mxu0 %v2447_v0 }
 0xdf3   :  { %v1308_v37 = vpop.permute.xlu1 %1307 }
 0xdf4   :  { %2108 = vmatmul.mubr.msk.f32.vlgmr.msra.gmra.mrb[14].mxu1 %vm71_vm1, %v1308_v37 }
 0xdf5   :  { %2242 = vmatpush3.bf16.msra.mxu1 %v2546_v23  ;;  %2129 = vmatprep.mubr.msk.f32.mxu1 %vm2449_vm0, %v2448_v1 }
 0xdf6   :  { %2243 = vmatprep.subr.bf16.mxu1 %v2447_v0 }
 0xdf9   :  { %2245 = vmatpush3.bf16.msra.mxu1 %v2557_v27 }
 0xdfa   :  { %2252 = vmatprep.subr.bf16.mxu1 %v2447_v0 }
 0xeaa   :  { %v1301_v38 = vpop.f32.mrb[22].mxu0 }
 0xeab   :  { %v1305_v4 = vadd.f32 %v1301_v38, %v2630_v6  ;;  %v2098_v39 = vpop.f32.mrb[23].mxu0 }
 0xead   :  { %2348 = vtanh.f32 %v1305_v4  ;;  %v1888_v45 = vmul.f32 -1.442695, %v1305_v4 }
 0xeb7   :  { %v2349_v40 = vpop.eup %2348 }
 0xeb8   :  { %1400 = vrot.lane.b32.xlu0 %v2349_v40, %s2450_s0 }
 0xec7   :  { %v1377_v41 = vpop.f32.mrb[14].mxu1 }
 0xec8   :  { %v1381_v42 = vadd.f32 %v1377_v41, %v2619_v57  ;;  %v2109_v43 = vpop.f32.mrb[15].mxu1 }
 0xeca   :  { %2350 = vtanh.f32 %v1381_v42  ;;  %v1889_v50 = vmul.f32 -1.442695, %v1381_v42 }
 0xecb   :  { %2352 = vpow2.f32 %v1888_v45 }
 0xed4   :  { %v2351_v44 = vpop.eup %2350 }
 0xed5   :  { %1402 = vrot.lane.b32.xlu1 %v2351_v44, %s2450_s0  ;;  %v2353_v47 = vpop.eup %2352 }
 0xed6   :  { %v1388_v48 = vadd.f32 1.0, %v2353_v47 }
 0xed8   :  { %2354 = vrcp.f32 %v1388_v48 }
 0xed9   :  { %2356 = vpow2.f32 %v1889_v50 }
 0xee2   :  { %v2355_v6 = vpop.eup %2354 }
 0xee3   :  { %v2357_v53 = vpop.eup %2356  ;;  %v1396_v58 = vmul.f32 %v2355_v6, %v1214_v26 }
 0xee4   :  { %v1389_v55 = vadd.f32 1.0, %v2357_v53 }
 0xee6   :  { %2358 = vrcp.f32 %v1389_v55 }
 0xef0   :  { %v2359_v57 = vpop.eup %2358 }
 0xef1   :  { %v1397_v3 = vmul.f32 %v2359_v57, %v1215_v31 }
 0xf2a   :  { %v1401_v54 = vpop.permute.xlu0 %1400 }
 0xf2b   :  { %v1406_v52 = vmul.f32 %v2355_v6, %v1401_v54 }
 0xf2d   :  { %1410 = vrot.lane.b32.xlu0 %v1406_v52, %s2450_s0 }
 0xf47   :  { %v1403_v56 = vpop.permute.xlu1 %1402 }
 0xf48   :  { %v1407_v8 = vmul.f32 %v2359_v57, %v1403_v56 }
 0xf4a   :  { %1412 = vrot.lane.b32.xlu1 %v1407_v8, %s2450_s0 }
 0xf9f   :  { %v1411_v60 = vpop.permute.xlu0 %1410 }
 0xfa0   :  { %v1416_v62 = vadd.f32 %v1411_v60, %v1396_v58 }
 0xfa2   :  { %2360 = vtanh.f32 %v1416_v62 }
 0xfac   :  { %v2361_v63 = vpop.eup %2360 }
 0xfad   :  { %1422 = vrot.lane.b32.xlu0 %v2361_v63, %s2450_s0 }
 0xfbc   :  { %v1413_v5 = vpop.permute.xlu1 %1412 }
 0xfbd   :  { %v1417_v7 = vadd.f32 %v1413_v5, %v1397_v3 }
 0xfbf   :  { %2362 = vtanh.f32 %v1417_v7 }
 0xfc9   :  { %v2363_v9 = vpop.eup %2362 }
 0xfca   :  { %1424 = vrot.lane.b32.xlu1 %v2363_v9, %s2450_s0 }
0x101f   :  { %v1423_v49 = vpop.permute.xlu0 %1422 }
0x1020   :  { %v1428_v12 = vmul.f32 %v2355_v6, %v1423_v49 }
0x1022   :  { %1433 = vrot.lane.b32.xlu0 %v1428_v12, %s2451_s4 }
0x103c   :  { %v1425_v14 = vpop.permute.xlu1 %1424 }
0x103d   :  { %v1429_v16 = vmul.f32 %v2359_v57, %v1425_v14 }
0x103f   :  { %1509 = vrot.lane.b32.xlu1 %v1429_v16, %s2451_s4 }
0x1094   :  { %v1434_v2 = vpop.permute.xlu0 %1433 }
0x1095   :  { %2119 = vmatmul.mubr.msk.f32.vlgmr.msra.gmra.mrb[24].mxu0 %vm71_vm1, %v1434_v2 }
0x1096   :  { %2248 = vmatpush3.bf16.msra.mxu0 %v2518_v10  ;;  %2140 = vmatprep.mubr.msk.f32.mxu0 %vm2449_vm0, %v2448_v1 }
0x1097   :  { %2249 = vmatprep.subr.bf16.mxu0 %v2447_v0 }
0x109a   :  { %2251 = vmatpush3.bf16.msra.mxu0 %v2539_v19 }
0x10b1   :  { %v1510_v17 = vpop.permute.xlu1 %1509 }
0x10b2   :  { %2130 = vmatmul.mubr.msk.f32.vlgmr.msra.gmra.mrb[16].mxu1 %vm71_vm1, %v1510_v17 }
0x10b3   :  { %2254 = vmatpush3.bf16.msra.mxu1 %v2546_v23  ;;  %2151 = vmatprep.mubr.msk.f32.mxu1 %vm2449_vm0, %v2448_v1 }
0x10b4   :  { %2255 = vmatprep.subr.bf16.mxu1 %v2447_v0 }
0x10b7   :  { %2257 = vmatpush3.bf16.msra.mxu1 %v2557_v27 }
0x1168   :  { %v1503_v10 = vpop.f32.mrb[24].mxu0 }
0x1169   :  { %v1507_v13 = vadd.f32 %v1503_v10, %v2634_v11  ;;  %v2120_v18 = vpop.f32.mrb[25].mxu0 }
0x116b   :  { %2364 = vtanh.f32 %v1507_v13  ;;  %v1892_v1 = vmul.f32 -1.442695, %v1507_v13 }
0x1175   :  { %v2365_v20 = vpop.eup %2364 }
0x1176   :  { %1602 = vrot.lane.b32.xlu0 %v2365_v20, %s2450_s0 }
0x1185   :  { %v1579_v19 = vpop.f32.mrb[16].mxu1 }
0x1186   :  { %v1583_v61 = vadd.f32 %v1579_v19, %v2615_v51  ;;  %v2131_v21 = vpop.f32.mrb[17].mxu1 }
0x1188   :  { %2366 = vtanh.f32 %v1583_v61  ;;  %v1893_v22 = vmul.f32 -1.442695, %v1583_v61 }
0x1189   :  { %2368 = vpow2.f32 %v1892_v1 }
0x1192   :  { %v2367_v23 = vpop.eup %2366 }
0x1193   :  { %1604 = vrot.lane.b32.xlu1 %v2367_v23, %s2450_s0  ;;  %v2369_v0 = vpop.eup %2368 }
0x1194   :  { %v1590_v27 = vadd.f32 1.0, %v2369_v0 }
0x1196   :  { %2370 = vrcp.f32 %v1590_v27 }
0x1197   :  { %2372 = vpow2.f32 %v1893_v22 }
0x11a0   :  { %v2371_v11 = vpop.eup %2370 }
0x11a1   :  { %v2373_v26 = vpop.eup %2372  ;;  %v1598_v31 = vmul.f32 %v2371_v11, %v1416_v62 }
0x11a2   :  { %v1591_v28 = vadd.f32 1.0, %v2373_v26 }
0x11a4   :  { %2374 = vrcp.f32 %v1591_v28 }
0x11ae   :  { %v2375_v51 = vpop.eup %2374 }
0x11af   :  { %v1599_v59 = vmul.f32 %v2375_v51, %v1417_v7 }
0x11e8   :  { %v1603_v24 = vpop.permute.xlu0 %1602 }
0x11e9   :  { %v1608_v25 = vmul.f32 %v2371_v11, %v1603_v24 }
0x11eb   :  { %1612 = vrot.lane.b32.xlu0 %v1608_v25, %s2450_s0 }
0x1205   :  { %v1605_v29 = vpop.permute.xlu1 %1604 }
0x1206   :  { %v1609_v30 = vmul.f32 %v2375_v51, %v1605_v29 }
0x1208   :  { %1614 = vrot.lane.b32.xlu1 %v1609_v30, %s2450_s0 }
0x125d   :  { %v1613_v32 = vpop.permute.xlu0 %1612 }
0x125e   :  { %v1618_v33 = vadd.f32 %v1613_v32, %v1598_v31 }
0x1260   :  { %2376 = vtanh.f32 %v1618_v33 }
0x126a   :  { %v2377_v34 = vpop.eup %2376 }
0x126b   :  { %1624 = vrot.lane.b32.xlu0 %v2377_v34, %s2450_s0 }
0x127a   :  { %v1615_v35 = vpop.permute.xlu1 %1614 }
0x127b   :  { %v1619_v36 = vadd.f32 %v1615_v35, %v1599_v59 }
0x127d   :  { %2378 = vtanh.f32 %v1619_v36 }
0x1287   :  { %v2379_v37 = vpop.eup %2378 }
0x1288   :  { %1626 = vrot.lane.b32.xlu1 %v2379_v37, %s2450_s0 }
0x12dd   :  { %v1625_v38 = vpop.permute.xlu0 %1624 }
0x12de   :  { %v1630_v4 = vmul.f32 %v2371_v11, %v1625_v38 }
0x12e0   :  { %1635 = vrot.lane.b32.xlu0 %v1630_v4, %s2451_s4 }
0x12fa   :  { %v1627_v39 = vpop.permute.xlu1 %1626 }
0x12fb   :  { %v1631_v40 = vmul.f32 %v2375_v51, %v1627_v39 }
0x12fd   :  { %1711 = vrot.lane.b32.xlu1 %v1631_v40, %s2451_s4 }
0x1352   :  { %v1636_v41 = vpop.permute.xlu0 %1635 }
0x1353   :  { %2141 = vmatmul.mubr.msk.f32.vlgmr.msra.gmra.mrb[26].mxu0 %vm71_vm1, %v1636_v41 }
0x136f   :  { %v1712_v42 = vpop.permute.xlu1 %1711 }
0x1370   :  { %2152 = vmatmul.mubr.msk.f32.vlgmr.msra.gmra.mrb[18].mxu1 %vm71_vm1, %v1712_v42 }
0x1426   :  { %v1705_v43 = vpop.f32.mrb[26].mxu0 }
0x1427   :  { %v1709_v44 = vadd.f32 %v1705_v43, %v2638_v15  ;;  %v2142_v45 = vpop.f32.mrb[27].mxu0 }
0x1429   :  { %2380 = vtanh.f32 %v1709_v44  ;;  %v1896_v52 = vmul.f32 -1.442695, %v1709_v44 }
0x1433   :  { %v2381_v47 = vpop.eup %2380 }
0x1434   :  { %1804 = vrot.lane.b32.xlu0 %v2381_v47, %s2450_s0 }
0x1443   :  { %v1781_v48 = vpop.f32.mrb[18].mxu1 }
0x1444   :  { %v1785_v50 = vadd.f32 %v1781_v48, %v2611_v46  ;;  %v2153_v6 = vpop.f32.mrb[19].mxu1 }
0x1446   :  { %2382 = vtanh.f32 %v1785_v50  ;;  %v1897_v57 = vmul.f32 -1.442695, %v1785_v50 }
0x1447   :  { %2384 = vpow2.f32 %v1896_v52 }
0x1450   :  { %v2383_v54 = vpop.eup %2382 }
0x1451   :  { %1806 = vrot.lane.b32.xlu1 %v2383_v54, %s2450_s0  ;;  %v2385_v53 = vpop.eup %2384 }
0x1452   :  { %v1792_v55 = vadd.f32 1.0, %v2385_v53 }
0x1454   :  { %2386 = vrcp.f32 %v1792_v55 }
0x1455   :  { %2388 = vpow2.f32 %v1897_v57 }
0x145e   :  { %v2387_v15 = vpop.eup %2386 }
0x145f   :  { %v2389_v58 = vpop.eup %2388  ;;  %v1800_v3 = vmul.f32 %v2387_v15, %v1618_v33 }
0x1460   :  { %v1793_v60 = vadd.f32 1.0, %v2389_v58 }
0x1462   :  { %2390 = vrcp.f32 %v1793_v60 }
0x146c   :  { %v2391_v46 = vpop.eup %2390 }
0x146d   :  { %v1801_v49 = vmul.f32 %v2391_v46, %v1619_v36 }
0x14a6   :  { %v1805_v56 = vpop.permute.xlu0 %1804 }
0x14a7   :  { %v1810_v8 = vmul.f32 %v2387_v15, %v1805_v56 }
0x14a9   :  { %1814 = vrot.lane.b32.xlu0 %v1810_v8, %s2450_s0 }
0x14c3   :  { %v1807_v62 = vpop.permute.xlu1 %1806 }
0x14c4   :  { %v1811_v63 = vmul.f32 %v2391_v46, %v1807_v62 }
0x14c6   :  { %1816 = vrot.lane.b32.xlu1 %v1811_v63, %s2450_s0 }
0x151b   :  { %v1815_v5 = vpop.permute.xlu0 %1814 }
0x151c   :  { %v1820_v7 = vadd.f32 %v1815_v5, %v1800_v3 }
0x151e   :  { %2392 = vtanh.f32 %v1820_v7 }
0x1528   :  { %v2393_v9 = vpop.eup %2392 }
0x1529   :  { %1826 = vrot.lane.b32.xlu0 %v2393_v9, %s2450_s0 }
0x1538   :  { %v1817_v12 = vpop.permute.xlu1 %1816 }
0x1539   :  { %v1821_v14 = vadd.f32 %v1817_v12, %v1801_v49 }
0x153b   :  { %2394 = vtanh.f32 %v1821_v14 }
0x1545   :  { %v2395_v16 = vpop.eup %2394 }
0x1546   :  { %1828 = vrot.lane.b32.xlu1 %v2395_v16, %s2450_s0 }
0x159b   :  { %v1827_v2 = vpop.permute.xlu0 %1826 }
0x159c   :  { %v1832_v17 = vmul.f32 %v2387_v15, %v1827_v2 }
0x159e   :  { %1835 = vrot.lane.b32.xlu0 %v1832_v17, %s2451_s4 }
0x15b8   :  { %v1829_v10 = vpop.permute.xlu1 %1828 }
0x15b9   :  { %v1833_v13 = vmul.f32 %v2391_v46, %v1829_v10 }
0x15bb   :  { %1839 = vrot.lane.b32.xlu1 %v1833_v13, %s2452_s20 }
0x1610   :  { %v1836_v18 = vpop.permute.xlu0 %1835 }
0x162d   :  { %v1840_v20 = vpop.permute.xlu1 %1839 }
0x162e   :  { %v1842_v19 = vsel %vm71_vm1, %v1836_v18, %v1840_v20 }
0x162f   :  { %1844 = vst.msk [vmem:[#allocation6] sm:$0xff] %vm1843_vm2, %v1842_v19 }
0x1630   :  { %2429 = shalt.err (!%p2426_p12)
}
0x1631   :  { %s2430_s26 = scalar_lea.hbm %s2818_s5, 128 }
0x1632   :  { %p2431_p13 = scmp.ne.s32.totalorder %s2818_s5, %s2430_s26  ;;  %p2434_p0 = scmp.lt.u32.totalorder %s2430_s26, %s2818_s5 }
0x1634   :  { %p2436_p1 = pnand %p2434_p0, %p2431_p13 }
0x1636   :  { %2439 = shalt.err (!%p2436_p1)
}
0x1637   :  { %1854 = dma.vmem_to_hbm [thread:$0]  %s1852_s22, 128, %s2818_s5, [#allocation5]  }
0x1638   :  { %2442 = dma.done.wait [#allocation5], 128  }
0x1639   :  { %2443 = vsyncadd [#allocation5], 4294967168 }
0x163a   :  { %1858 = vsyncpa [#allocation4], 1 }
0x163b   :  { %1859 = vsyncpa [#allocation5], 1 }

</bundles_post_ra>
